<compile_context>
chip_gen: v6e
topology: v6e:2x2x1
jax: 0.10.0
libtpu: 0.0.40
codegen_flags: <defaults>
</compile_context>

<pallas_src>
import functools

import jax
import jax.numpy as jnp
from jax.experimental import pallas as pl
from jax.experimental.pallas import tpu as pltpu

NEG_BIG = -1.0e9
_VMEM_LIMIT = 32 * 1024 * 1024  # safe on v5e/v6e/v7x


def _round_up(x, m):
    return ((x + m - 1) // m) * m


# ----------------------------------------------------------------------------
# Kernel 1: single-K-step bf16 matmul  A(M,D) @ B(D,N) -> f32 (M,N)
# ----------------------------------------------------------------------------
def _matmul_kernel(a_ref, b_ref, o_ref):
    o_ref[...] = jnp.dot(a_ref[...], b_ref[...],
                         preferred_element_type=jnp.float32)


def matmul(a, b, *, tm_max=256, tn_max=512):
    """a: (M, D) bf16, b: (D, N) bf16 (pre-transposed bank) -> (M, N) f32.

    Embedding D is small (<= a few thousand), so the whole contraction fits a
    single VMEM block: no K grid axis, no accumulator scratch, output written
    exactly once.
    """
    M, Kd = a.shape
    Kd2, N = b.shape
    assert Kd == Kd2

    tm = min(tm_max, _round_up(M, 16))   # 16: bf16 packs 2 rows per sublane
    tn = min(tn_max, _round_up(N, 128))
    Kp = _round_up(Kd, 128)
    Mp, Np = _round_up(M, tm), _round_up(N, tn)

    a_p = a if (Mp == M and Kp == Kd) else jnp.pad(a, ((0, Mp - M), (0, Kp - Kd)))
    b_p = b if (Kp == Kd and Np == N) else jnp.pad(b, ((0, Kp - Kd), (0, Np - N)))

    out = pl.pallas_call(
        _matmul_kernel,
        out_shape=jax.ShapeDtypeStruct((Mp, Np), jnp.float32),
        grid=(Mp // tm, Np // tn),
        in_specs=[
            pl.BlockSpec((tm, Kp), lambda i, j: (i, 0)),
            pl.BlockSpec((Kp, tn), lambda i, j: (0, j)),
        ],
        out_specs=pl.BlockSpec((tm, tn), lambda i, j: (i, j)),
        compiler_params=pltpu.CompilerParams(
            dimension_semantics=("parallel", "parallel"),
            vmem_limit_bytes=_VMEM_LIMIT,
        ),
    )(a_p, b_p)
    return out[:M, :N]


# ----------------------------------------------------------------------------
# Row-tile sizing shared by the two fusion kernels
# ----------------------------------------------------------------------------
def _pick_row_tile(n_rows, bytes_per_row, *, max_tile=1024, budget_bytes=16 << 20):
    # budget covers double-buffered ctx/q/out/score blocks.
    t = budget_bytes // max(2 * bytes_per_row, 1)
    t = max(8, min(max_tile, (t // 8) * 8))
    t = min(t, _round_up(n_rows, 8))
    return t


# ----------------------------------------------------------------------------
# Kernel 2: image fusion
#   out[n] = q[n] + sum_r softmax(scores[n])_r * ctx[r, n]
# ctx is streamed R-major (R, N, D) in bf16 -> dense (tn, D) slabs, unrolled
# VALU accumulation (no sublane padding, no XLU reduce, no (tn,R,D) temp).
# ----------------------------------------------------------------------------
def _attn_fuse_kernel(R, s_ref, ctx_ref, q_ref, o_ref):
    s = s_ref[...]                                            # (tn, R) f32
    m = jnp.max(s, axis=-1, keepdims=True)
    e = jnp.exp(s - m)
    # EUP approx reciprocal: divide is effectively free in this VPU-bound body.
    w = e * pl.reciprocal(jnp.sum(e, axis=-1, keepdims=True), approx=True)
    acc = q_ref[...]                                          # (tn, D) f32
    for r in range(R):                                        # static unroll
        acc = acc + w[:, r:r + 1] * ctx_ref[r].astype(jnp.float32)
    o_ref[...] = acc


def attn_fuse(scores, ctx_rm, q):
    """scores (N, R) f32, ctx_rm (R, N, D) bf16, q (N, D) f32 -> (N, D) f32."""
    N, R = scores.shape
    R2, N2, D = ctx_rm.shape
    assert R2 == R and N2 == N
    bytes_per_row = R * D * 2 + 2 * D * 4 + R * 4
    tn = _pick_row_tile(N, bytes_per_row)
    Np = _round_up(N, tn)
    pad = Np - N
    if pad:
        scores = jnp.pad(scores, ((0, pad), (0, 0)))
        ctx_rm = jnp.pad(ctx_rm, ((0, 0), (0, pad), (0, 0)))
        q = jnp.pad(q, ((0, pad), (0, 0)))

    out = pl.pallas_call(
        functools.partial(_attn_fuse_kernel, R),
        out_shape=jax.ShapeDtypeStruct((Np, D), jnp.float32),
        grid=(Np // tn,),
        in_specs=[
            pl.BlockSpec((tn, R), lambda i: (i, 0)),
            pl.BlockSpec((R, tn, D), lambda i: (0, i, 0)),
            pl.BlockSpec((tn, D), lambda i: (i, 0)),
        ],
        out_specs=pl.BlockSpec((tn, D), lambda i: (i, 0)),
        compiler_params=pltpu.CompilerParams(
            dimension_semantics=("parallel",),
            vmem_limit_bytes=_VMEM_LIMIT,
        ),
    )(scores, ctx_rm, q)
    return out[:N]


# ----------------------------------------------------------------------------
# Kernel 3: knowledge fusion, stages 1+2 fused, gridded over B*C groups.
#   stage1[n, r] = sum_k softmax(kscores[n, r])_k * ctx[k, r, n]   (VMEM only)
#   out[n]       = q[n] + sum_r softmax(iscores[n])_r * stage1[n, r]
# ----------------------------------------------------------------------------
def _knowledge_fuse_kernel(R, K, ks_ref, is_ref, ctx_ref, q_ref, o_ref):
    si = is_ref[...]                                          # (tg, R) f32
    mi = jnp.max(si, axis=-1, keepdims=True)
    ei = jnp.exp(si - mi)
    wi = ei * pl.reciprocal(jnp.sum(ei, axis=-1, keepdims=True), approx=True)

    ks = ks_ref[...]                                          # (tg, R*K) f32
    acc = q_ref[...]                                          # (tg, D) f32
    for r in range(R):                                        # static unroll
        sr = ks[:, r * K:(r + 1) * K]                         # (tg, K)
        mr = jnp.max(sr, axis=-1, keepdims=True)
        er = jnp.exp(sr - mr)
        wr = er * pl.reciprocal(jnp.sum(er, axis=-1, keepdims=True), approx=True)
        fused_r = wr[:, 0:1] * ctx_ref[0, r].astype(jnp.float32)
        for k in range(1, K):                                 # static unroll
            fused_r = fused_r + wr[:, k:k + 1] * ctx_ref[k, r].astype(jnp.float32)
        acc = acc + wi[:, r:r + 1] * fused_r
    o_ref[...] = acc


def knowledge_fuse(k_scores_flat, image_scores, ctx_krm, q, *, R, K):
    """k_scores_flat (G, R*K) f32, image_scores (G, R) f32,
    ctx_krm (K, R, G, D) bf16, q (G, D) f32 -> (G, D) f32."""
    G, RK = k_scores_flat.shape
    assert RK == R * K
    Kc, Rc, G2, D = ctx_krm.shape
    assert Kc == K and Rc == R and G2 == G
    bytes_per_row = K * R * D * 2 + 2 * D * 4 + (R * K + R) * 4
    tg = _pick_row_tile(G, bytes_per_row)
    Gp = _round_up(G, tg)
    pad = Gp - G
    if pad:
        k_scores_flat = jnp.pad(k_scores_flat, ((0, pad), (0, 0)))
        image_scores = jnp.pad(image_scores, ((0, pad), (0, 0)))
        ctx_krm = jnp.pad(ctx_krm, ((0, 0), (0, 0), (0, pad), (0, 0)))
        q = jnp.pad(q, ((0, pad), (0, 0)))

    out = pl.pallas_call(
        functools.partial(_knowledge_fuse_kernel, R, K),
        out_shape=jax.ShapeDtypeStruct((Gp, D), jnp.float32),
        grid=(Gp // tg,),
        in_specs=[
            pl.BlockSpec((tg, R * K), lambda i: (i, 0)),
            pl.BlockSpec((tg, R), lambda i: (i, 0)),
            pl.BlockSpec((K, R, tg, D), lambda i: (0, 0, i, 0)),
            pl.BlockSpec((tg, D), lambda i: (i, 0)),
        ],
        out_specs=pl.BlockSpec((tg, D), lambda i: (i, 0)),
        compiler_params=pltpu.CompilerParams(
            dimension_semantics=("parallel",),
            vmem_limit_bytes=_VMEM_LIMIT,
        ),
    )(k_scores_flat, image_scores, ctx_krm, q)
    return out[:G]


# ----------------------------------------------------------------------------
# MainModel.forward in JAX (glue) + Pallas hot paths
# ----------------------------------------------------------------------------
@functools.partial(jax.jit, static_argnames=("image_retrieval_number",
                                             "knowledge_retrieval_number"))
def main_model_forward(query_embeddings,          # (B, D)
                       all_image_embeddings,      # (N_img, D)
                       all_knowledge_embeddings,  # (N_k, D)
                       image_label_mask,          # (N_img, C) 0/1
                       knowledge_class_masks,     # (C, N_k)  bool
                       *,
                       image_retrieval_number: int,
                       knowledge_retrieval_number: int):
    B, D = query_embeddings.shape
    N_img = all_image_embeddings.shape[0]
    N_k = all_knowledge_embeddings.shape[0]
    C = image_label_mask.shape[1]
    R = image_retrieval_number
    K = knowledge_retrieval_number

    # One-time layout / dtype prep of the static banks.
    q_bf = query_embeddings.astype(jnp.bfloat16)
    img_bank_bf = all_image_embeddings.astype(jnp.bfloat16)          # (N_img, D)
    know_bank_bf = all_knowledge_embeddings.astype(jnp.bfloat16)     # (N_k, D)
    img_bank_T = img_bank_bf.T                                       # (D, N_img)
    know_bank_T = know_bank_bf.T                                     # (D, N_k)

    # ---- EmbeddingSelector.get_similar_samples ------------------------------
    sim = matmul(q_bf, img_bank_T)                                   # (B, N_img) f32
    class_mask = image_label_mask.T.astype(bool)                     # (C, N_img)
    masked_sim = jnp.where(class_mask[None, :, :], sim[:, None, :], -jnp.inf)
    vals, idx = jax.lax.top_k(masked_sim, R)                         # (B, C, R)
    valid_mask = jnp.isfinite(vals)
    attn_scores = jnp.where(valid_mask, vals, NEG_BIG)               # (B, C, R)
    padded_indices = jnp.where(valid_mask, idx, 0)

    # R-major gather (R, B*C, D) bf16: dense (tn, D) slabs inside the kernel.
    idx_rm = padded_indices.reshape(B * C, R).T                      # (R, B*C)
    vmask_rm = valid_mask.reshape(B * C, R).T                        # (R, B*C)
    similar_images_rm = img_bank_bf[idx_rm]                          # (R, B*C, D)
    similar_images_rm = jnp.where(vmask_rm[..., None], similar_images_rm, 0)

    q_rep = jnp.broadcast_to(query_embeddings[:, None, :],
                             (B, C, D)).reshape(B * C, D)            # (B*C, D) f32
    image_scores = attn_scores.reshape(B * C, R)

    # ---- image_fusion.fuse_embeddings_batch (Pallas) -------------------------
    enhanced_images = attn_fuse(image_scores, similar_images_rm,
                                q_rep).reshape(B, C, D)

    # ---- knowledge retrieval --------------------------------------------------
    # Retrieved image rows are duplicates of bank rows: compute the bank-to-bank
    # similarity table ONCE and gather rows, instead of a (B*C*R, N_k) matmul.
    ksim_table = matmul(img_bank_bf, know_bank_T)                    # (N_img, N_k) f32
    ksim = ksim_table[padded_indices]                                # (B, C, R, N_k)
    ksim = jnp.where(valid_mask[..., None], ksim, 0.0)               # == zero-row sim
    ksim = ksim.reshape(B * C * R, N_k)

    row_class = (jnp.arange(B * C * R) // R) % C                     # class per flat row
    knowledge_mask = knowledge_class_masks[row_class]                # (B*C*R, N_k)
    masked_ksim = jnp.where(knowledge_mask, ksim, -jnp.inf)
    kvals, kidx = jax.lax.top_k(masked_ksim, K)                      # (B*C*R, K)
    kvalid = jnp.isfinite(kvals)
    k_scores = jnp.where(kvalid, kvals, NEG_BIG)
    padded_kidx = jnp.where(kvalid, kidx, 0)

    # (K, R, B*C, D) bf16 gather for the fused two-stage kernel.
    kidx_krm = padded_kidx.reshape(B * C, R, K).transpose(2, 1, 0)   # (K, R, B*C)
    kvalid_krm = kvalid.reshape(B * C, R, K).transpose(2, 1, 0)      # (K, R, B*C)
    selected_knowledge_krm = know_bank_bf[kidx_krm]                  # (K, R, B*C, D)
    selected_knowledge_krm = jnp.where(kvalid_krm[..., None],
                                       selected_knowledge_krm, 0)

    # ---- knowledge_fusion.fuse_embeddings_batch (Pallas, single fused kernel)
    # stage 1 (softmax over K) + stage 2 (softmax over R + query residual) are
    # done per group block entirely in VMEM; no (B*C*R, D) intermediate in HBM.
    k_scores_flat = k_scores.reshape(B * C, R * K)
    enhanced_knowledge = knowledge_fuse(
        k_scores_flat, image_scores, selected_knowledge_krm, q_rep,
        R=R, K=K).reshape(B, C, D)

    return enhanced_images, enhanced_knowledge


# ----------------------------------------------------------------------------
# Driver
# ----------------------------------------------------------------------------
if __name__ == "__main__":
    # Small shapes consistent with the module's forward pass.
    B = 8          # batch of query embeddings
    D = 128        # embedding dim (lane-aligned)
    C = 4          # num_classes (unique diseases)
    N_IMG = 32     # number of training image samples
    N_K = 32       # number of knowledge texts
    R = 4          # config.image_retrieval_number
    K = 2          # config.knowledge_retrieval_number

    # Deterministic "__init__" state: cycle disease labels over classes.
    img_labels = jnp.arange(N_IMG) % C
    image_label_mask = jax.nn.one_hot(img_labels, C, dtype=jnp.float32)      # (N_IMG, C)
    know_labels = jnp.arange(N_K) % C
    knowledge_class_masks = jax.nn.one_hot(know_labels, C).T.astype(bool)    # (C, N_K)

    key = jax.random.PRNGKey(0)
    kq, ki, kk = jax.random.split(key, 3)
    query_embeddings = jax.random.normal(kq, (B, D), dtype=jnp.float32)
    all_image_embeddings = jax.random.normal(ki, (N_IMG, D), dtype=jnp.float32)
    all_knowledge_embeddings = jax.random.normal(kk, (N_K, D), dtype=jnp.float32)

    enhanced_images, enhanced_knowledge = main_model_forward(
        query_embeddings,
        all_image_embeddings,
        all_knowledge_embeddings,
        image_label_mask,
        knowledge_class_masks,
        image_retrieval_number=R,
        knowledge_retrieval_number=K,
    )
    jax.block_until_ready((enhanced_images, enhanced_knowledge))

    assert enhanced_images.shape == (B, C, D)
    assert enhanced_knowledge.shape == (B, C, D)
    assert bool(jnp.all(jnp.isfinite(enhanced_images)))
    assert bool(jnp.all(jnp.isfinite(enhanced_knowledge)))

    print("KERNEL_OK")
</pallas_src>

<mosaic_0001>
module attributes {stable_mosaic.version = 11 : i64} {
  func.func @_matmul_kernel(%arg0: i32, %arg1: i32, %arg2: memref<16x128xbf16, #tpu.memory_space<vmem>>, %arg3: memref<128x128xbf16, #tpu.memory_space<vmem>>, %arg4: memref<16x128xf32, #tpu.memory_space<vmem>>) attributes {dimension_semantics = [#tpu.dimension_semantics<parallel>, #tpu.dimension_semantics<parallel>], iteration_bounds = array<i64: 1, 1>, scalar_prefetch = 0 : i64, scratch_operands = 0 : i64, tpu.core_type = #tpu.core_type<tc>, window_params = [{transform_indices = @transform_0, window_bounds = array<i64: 16, 128>}, {transform_indices = @transform_1, window_bounds = array<i64: 128, 128>}, {transform_indices = @transform_2, window_bounds = array<i64: 16, 128>}]} {
    %c0 = arith.constant 0 : index
    %c0_0 = arith.constant 0 : index
    %0 = vector.load %arg2[%c0, %c0_0] : memref<16x128xbf16, #tpu.memory_space<vmem>>, vector<16x128xbf16>
    %c0_1 = arith.constant 0 : index
    %c0_2 = arith.constant 0 : index
    %1 = vector.load %arg3[%c0_1, %c0_2] : memref<128x128xbf16, #tpu.memory_space<vmem>>, vector<128x128xbf16>
    %cst = arith.constant dense<0.000000e+00> : vector<16x128xf32>
    %2 = tpu.matmul %0, %1, %cst {dimension_numbers = #tpu.dot_dimension_numbers<[1], [0], [0], [1], [0, 0, 1, 1], [], []>} : vector<16x128xbf16>, vector<128x128xbf16>, vector<16x128xf32> -> vector<16x128xf32>
    %c0_3 = arith.constant 0 : index
    %c0_4 = arith.constant 0 : index
    %3 = vector.load %arg4[%c0_3, %c0_4] : memref<16x128xf32, #tpu.memory_space<vmem>>, vector<16x128xf32>
    tpu.vector_store %arg4[%c0_3, %c0_4], %2 {strides = array<i32>} : memref<16x128xf32, #tpu.memory_space<vmem>>, vector<16x128xf32>,
    return
  }
  func.func @transform_0(%arg0: i32, %arg1: i32) -> (i32, i32) {
    %c0_i32 = arith.constant 0 : i32
    %c0_i32_0 = arith.constant 0 : i32
    return %arg0, %c0_i32 : i32, i32
  }
  func.func @transform_1(%arg0: i32, %arg1: i32) -> (i32, i32) {
    %c0_i32 = arith.constant 0 : i32
    %c0_i32_0 = arith.constant 0 : i32
    return %c0_i32, %arg1 : i32, i32
  }
  func.func @transform_2(%arg0: i32, %arg1: i32) -> (i32, i32) {
    %c0_i32 = arith.constant 0 : i32
    return %arg0, %arg1 : i32, i32
  }
}

module attributes {stable_mosaic.version = 11 : i64} {
  func.func @_attn_fuse_kernel(%arg0: i32, %arg1: memref<32x4xf32, #tpu.memory_space<vmem>>, %arg2: memref<4x32x128xbf16, #tpu.memory_space<vmem>>, %arg3: memref<32x128xf32, #tpu.memory_space<vmem>>, %arg4: memref<32x128xf32, #tpu.memory_space<vmem>>) attributes {dimension_semantics = [#tpu.dimension_semantics<parallel>], iteration_bounds = array<i64: 1>, scalar_prefetch = 0 : i64, scratch_operands = 0 : i64, tpu.core_type = #tpu.core_type<tc>, window_params = [{transform_indices = @transform_0, window_bounds = array<i64: 32, 4>}, {transform_indices = @transform_1, window_bounds = array<i64: 4, 32, 128>}, {transform_indices = @transform_2, window_bounds = array<i64: 32, 128>}, {transform_indices = @transform_3, window_bounds = array<i64: 32, 128>}]} {
    %c0 = arith.constant 0 : index
    %c0_0 = arith.constant 0 : index
    %0 = vector.load %arg1[%c0, %c0_0] : memref<32x4xf32, #tpu.memory_space<vmem>>, vector<32x4xf32>
    %cst = arith.constant dense<0xFF800000> : vector<32xf32>
    %1 = vector.multi_reduction <maximumf>, %0, %cst [1] : vector<32x4xf32> to vector<32xf32>
    %2 = vector.shape_cast %1 : vector<32xf32> to vector<32x1xf32>
    %3 = vector.broadcast %2 : vector<32x1xf32> to vector<32x4xf32>
    %4 = arith.subf %0, %3 : vector<32x4xf32>
    %5 = math.exp %4 : vector<32x4xf32>
    %cst_1 = arith.constant dense<0.000000e+00> : vector<32xf32>
    %6 = vector.multi_reduction <add>, %5, %cst_1 [1] : vector<32x4xf32> to vector<32xf32>
    %7 = vector.shape_cast %6 : vector<32xf32> to vector<32x1xf32>
    %8 = tpu.reciprocal %7 {approx = true} : vector<32x1xf32> -> vector<32x1xf32>
    %9 = vector.broadcast %8 : vector<32x1xf32> to vector<32x4xf32>
    %10 = arith.mulf %5, %9 : vector<32x4xf32>
    %c0_2 = arith.constant 0 : index
    %c0_3 = arith.constant 0 : index
    %11 = vector.load %arg3[%c0_2, %c0_3] : memref<32x128xf32, #tpu.memory_space<vmem>>, vector<32x128xf32>
    %12 = vector.extract_strided_slice %10 {offsets = [0, 0], sizes = [32, 1], strides = [1, 1]} : vector<32x4xf32> to vector<32x1xf32>
    %c0_4 = arith.constant 0 : index
    %c0_5 = arith.constant 0 : index
    %c0_6 = arith.constant 0 : index
    %13 = vector.load %arg2[%c0_4, %c0_5, %c0_6] : memref<4x32x128xbf16, #tpu.memory_space<vmem>>, vector<1x32x128xbf16>
    %14 = vector.shape_cast %13 : vector<1x32x128xbf16> to vector<32x128xbf16>
    %15 = arith.extf %14 : vector<32x128xbf16> to vector<32x128xf32>
    %16 = vector.broadcast %12 : vector<32x1xf32> to vector<32x128xf32>
    %17 = arith.mulf %16, %15 : vector<32x128xf32>
    %18 = arith.addf %11, %17 : vector<32x128xf32>
    %19 = vector.extract_strided_slice %10 {offsets = [0, 1], sizes = [32, 1], strides = [1, 1]} : vector<32x4xf32> to vector<32x1xf32>
    %c1 = arith.constant 1 : index
    %c0_7 = arith.constant 0 : index
    %c0_8 = arith.constant 0 : index
    %20 = vector.load %arg2[%c1, %c0_7, %c0_8] : memref<4x32x128xbf16, #tpu.memory_space<vmem>>, vector<1x32x128xbf16>
    %21 = vector.shape_cast %20 : vector<1x32x128xbf16> to vector<32x128xbf16>
    %22 = arith.extf %21 : vector<32x128xbf16> to vector<32x128xf32>
    %23 = vector.broadcast %19 : vector<32x1xf32> to vector<32x128xf32>
    %24 = arith.mulf %23, %22 : vector<32x128xf32>
    %25 = arith.addf %18, %24 : vector<32x128xf32>
    %26 = vector.extract_strided_slice %10 {offsets = [0, 2], sizes = [32, 1], strides = [1, 1]} : vector<32x4xf32> to vector<32x1xf32>
    %c2 = arith.constant 2 : index
    %c0_9 = arith.constant 0 : index
    %c0_10 = arith.constant 0 : index
    %27 = vector.load %arg2[%c2, %c0_9, %c0_10] : memref<4x32x128xbf16, #tpu.memory_space<vmem>>, vector<1x32x128xbf16>
    %28 = vector.shape_cast %27 : vector<1x32x128xbf16> to vector<32x128xbf16>
    %29 = arith.extf %28 : vector<32x128xbf16> to vector<32x128xf32>
    %30 = vector.broadcast %26 : vector<32x1xf32> to vector<32x128xf32>
    %31 = arith.mulf %30, %29 : vector<32x128xf32>
    %32 = arith.addf %25, %31 : vector<32x128xf32>
    %33 = vector.extract_strided_slice %10 {offsets = [0, 3], sizes = [32, 1], strides = [1, 1]} : vector<32x4xf32> to vector<32x1xf32>
    %c3 = arith.constant 3 : index
    %c0_11 = arith.constant 0 : index
    %c0_12 = arith.constant 0 : index
    %34 = vector.load %arg2[%c3, %c0_11, %c0_12] : memref<4x32x128xbf16, #tpu.memory_space<vmem>>, vector<1x32x128xbf16>
    %35 = vector.shape_cast %34 : vector<1x32x128xbf16> to vector<32x128xbf16>
    %36 = arith.extf %35 : vector<32x128xbf16> to vector<32x128xf32>
    %37 = vector.broadcast %33 : vector<32x1xf32> to vector<32x128xf32>
    %38 = arith.mulf %37, %36 : vector<32x128xf32>
    %39 = arith.addf %32, %38 : vector<32x128xf32>
    %c0_13 = arith.constant 0 : index
    %c0_14 = arith.constant 0 : index
    %40 = vector.load %arg4[%c0_13, %c0_14] : memref<32x128xf32, #tpu.memory_space<vmem>>, vector<32x128xf32>
    tpu.vector_store %arg4[%c0_13, %c0_14], %39 {strides = array<i32>} : memref<32x128xf32, #tpu.memory_space<vmem>>, vector<32x128xf32>,
    return
  }
  func.func @transform_0(%arg0: i32) -> (i32, i32) {
    %c0_i32 = arith.constant 0 : i32
    %c0_i32_0 = arith.constant 0 : i32
    return %arg0, %c0_i32 : i32, i32
  }
  func.func @transform_1(%arg0: i32) -> (i32, i32, i32) {
    %c0_i32 = arith.constant 0 : i32
    %c0_i32_0 = arith.constant 0 : i32
    %c0_i32_1 = arith.constant 0 : i32
    return %c0_i32, %arg0, %c0_i32_0 : i32, i32, i32
  }
  func.func @transform_2(%arg0: i32) -> (i32, i32) {
    %c0_i32 = arith.constant 0 : i32
    %c0_i32_0 = arith.constant 0 : i32
    return %arg0, %c0_i32 : i32, i32
  }
  func.func @transform_3(%arg0: i32) -> (i32, i32) {
    %c0_i32 = arith.constant 0 : i32
    %c0_i32_0 = arith.constant 0 : i32
    return %arg0, %c0_i32 : i32, i32
  }
}

module attributes {stable_mosaic.version = 11 : i64} {
  func.func @_matmul_kernel(%arg0: i32, %arg1: i32, %arg2: memref<32x128xbf16, #tpu.memory_space<vmem>>, %arg3: memref<128x128xbf16, #tpu.memory_space<vmem>>, %arg4: memref<32x128xf32, #tpu.memory_space<vmem>>) attributes {dimension_semantics = [#tpu.dimension_semantics<parallel>, #tpu.dimension_semantics<parallel>], iteration_bounds = array<i64: 1, 1>, scalar_prefetch = 0 : i64, scratch_operands = 0 : i64, tpu.core_type = #tpu.core_type<tc>, window_params = [{transform_indices = @transform_0, window_bounds = array<i64: 32, 128>}, {transform_indices = @transform_1, window_bounds = array<i64: 128, 128>}, {transform_indices = @transform_2, window_bounds = array<i64: 32, 128>}]} {
    %c0 = arith.constant 0 : index
    %c0_0 = arith.constant 0 : index
    %0 = vector.load %arg2[%c0, %c0_0] : memref<32x128xbf16, #tpu.memory_space<vmem>>, vector<32x128xbf16>
    %c0_1 = arith.constant 0 : index
    %c0_2 = arith.constant 0 : index
    %1 = vector.load %arg3[%c0_1, %c0_2] : memref<128x128xbf16, #tpu.memory_space<vmem>>, vector<128x128xbf16>
    %cst = arith.constant dense<0.000000e+00> : vector<32x128xf32>
    %2 = tpu.matmul %0, %1, %cst {dimension_numbers = #tpu.dot_dimension_numbers<[1], [0], [0], [1], [0, 0, 1, 1], [], []>} : vector<32x128xbf16>, vector<128x128xbf16>, vector<32x128xf32> -> vector<32x128xf32>
    %c0_3 = arith.constant 0 : index
    %c0_4 = arith.constant 0 : index
    %3 = vector.load %arg4[%c0_3, %c0_4] : memref<32x128xf32, #tpu.memory_space<vmem>>, vector<32x128xf32>
    tpu.vector_store %arg4[%c0_3, %c0_4], %2 {strides = array<i32>} : memref<32x128xf32, #tpu.memory_space<vmem>>, vector<32x128xf32>,
    return
  }
  func.func @transform_0(%arg0: i32, %arg1: i32) -> (i32, i32) {
    %c0_i32 = arith.constant 0 : i32
    %c0_i32_0 = arith.constant 0 : i32
    return %arg0, %c0_i32 : i32, i32
  }
  func.func @transform_1(%arg0: i32, %arg1: i32) -> (i32, i32) {
    %c0_i32 = arith.constant 0 : i32
    %c0_i32_0 = arith.constant 0 : i32
    return %c0_i32, %arg1 : i32, i32
  }
  func.func @transform_2(%arg0: i32, %arg1: i32) -> (i32, i32) {
    %c0_i32 = arith.constant 0 : i32
    return %arg0, %arg1 : i32, i32
  }
}

module attributes {stable_mosaic.version = 11 : i64} {
  func.func @_knowledge_fuse_kernel(%arg0: i32, %arg1: memref<32x8xf32, #tpu.memory_space<vmem>>, %arg2: memref<32x4xf32, #tpu.memory_space<vmem>>, %arg3: memref<2x4x32x128xbf16, #tpu.memory_space<vmem>>, %arg4: memref<32x128xf32, #tpu.memory_space<vmem>>, %arg5: memref<32x128xf32, #tpu.memory_space<vmem>>) attributes {dimension_semantics = [#tpu.dimension_semantics<parallel>], iteration_bounds = array<i64: 1>, scalar_prefetch = 0 : i64, scratch_operands = 0 : i64, tpu.core_type = #tpu.core_type<tc>, window_params = [{transform_indices = @transform_0, window_bounds = array<i64: 32, 8>}, {transform_indices = @transform_1, window_bounds = array<i64: 32, 4>}, {transform_indices = @transform_2, window_bounds = array<i64: 2, 4, 32, 128>}, {transform_indices = @transform_3, window_bounds = array<i64: 32, 128>}, {transform_indices = @transform_4, window_bounds = array<i64: 32, 128>}]} {
    %c0 = arith.constant 0 : index
    %c0_0 = arith.constant 0 : index
    %0 = vector.load %arg2[%c0, %c0_0] : memref<32x4xf32, #tpu.memory_space<vmem>>, vector<32x4xf32>
    %cst = arith.constant dense<0xFF800000> : vector<32xf32>
    %1 = vector.multi_reduction <maximumf>, %0, %cst [1] : vector<32x4xf32> to vector<32xf32>
    %2 = vector.shape_cast %1 : vector<32xf32> to vector<32x1xf32>
    %3 = vector.broadcast %2 : vector<32x1xf32> to vector<32x4xf32>
    %4 = arith.subf %0, %3 : vector<32x4xf32>
    %5 = math.exp %4 : vector<32x4xf32>
    %cst_1 = arith.constant dense<0.000000e+00> : vector<32xf32>
    %6 = vector.multi_reduction <add>, %5, %cst_1 [1] : vector<32x4xf32> to vector<32xf32>
    %7 = vector.shape_cast %6 : vector<32xf32> to vector<32x1xf32>
    %8 = tpu.reciprocal %7 {approx = true} : vector<32x1xf32> -> vector<32x1xf32>
    %9 = vector.broadcast %8 : vector<32x1xf32> to vector<32x4xf32>
    %10 = arith.mulf %5, %9 : vector<32x4xf32>
    %c0_2 = arith.constant 0 : index
    %c0_3 = arith.constant 0 : index
    %11 = vector.load %arg1[%c0_2, %c0_3] : memref<32x8xf32, #tpu.memory_space<vmem>>, vector<32x8xf32>
    %c0_4 = arith.constant 0 : index
    %c0_5 = arith.constant 0 : index
    %12 = vector.load %arg4[%c0_4, %c0_5] : memref<32x128xf32, #tpu.memory_space<vmem>>, vector<32x128xf32>
    %13 = vector.extract_strided_slice %11 {offsets = [0, 0], sizes = [32, 2], strides = [1, 1]} : vector<32x8xf32> to vector<32x2xf32>
    %cst_6 = arith.constant dense<0xFF800000> : vector<32xf32>
    %14 = vector.multi_reduction <maximumf>, %13, %cst_6 [1] : vector<32x2xf32> to vector<32xf32>
    %15 = vector.shape_cast %14 : vector<32xf32> to vector<32x1xf32>
    %16 = vector.broadcast %15 : vector<32x1xf32> to vector<32x2xf32>
    %17 = arith.subf %13, %16 : vector<32x2xf32>
    %18 = math.exp %17 : vector<32x2xf32>
    %cst_7 = arith.constant dense<0.000000e+00> : vector<32xf32>
    %19 = vector.multi_reduction <add>, %18, %cst_7 [1] : vector<32x2xf32> to vector<32xf32>
    %20 = vector.shape_cast %19 : vector<32xf32> to vector<32x1xf32>
    %21 = tpu.reciprocal %20 {approx = true} : vector<32x1xf32> -> vector<32x1xf32>
    %22 = vector.broadcast %21 : vector<32x1xf32> to vector<32x2xf32>
    %23 = arith.mulf %18, %22 : vector<32x2xf32>
    %24 = vector.extract_strided_slice %23 {offsets = [0, 0], sizes = [32, 1], strides = [1, 1]} : vector<32x2xf32> to vector<32x1xf32>
    %c0_8 = arith.constant 0 : index
    %c0_9 = arith.constant 0 : index
    %c0_10 = arith.constant 0 : index
    %c0_11 = arith.constant 0 : index
    %25 = vector.load %arg3[%c0_8, %c0_9, %c0_10, %c0_11] : memref<2x4x32x128xbf16, #tpu.memory_space<vmem>>, vector<1x1x32x128xbf16>
    %26 = vector.shape_cast %25 : vector<1x1x32x128xbf16> to vector<32x128xbf16>
    %27 = arith.extf %26 : vector<32x128xbf16> to vector<32x128xf32>
    %28 = vector.broadcast %24 : vector<32x1xf32> to vector<32x128xf32>
    %29 = arith.mulf %28, %27 : vector<32x128xf32>
    %30 = vector.extract_strided_slice %23 {offsets = [0, 1], sizes = [32, 1], strides = [1, 1]} : vector<32x2xf32> to vector<32x1xf32>
    %c1 = arith.constant 1 : index
    %c0_12 = arith.constant 0 : index
    %c0_13 = arith.constant 0 : index
    %c0_14 = arith.constant 0 : index
    %31 = vector.load %arg3[%c1, %c0_12, %c0_13, %c0_14] : memref<2x4x32x128xbf16, #tpu.memory_space<vmem>>, vector<1x1x32x128xbf16>
    %32 = vector.shape_cast %31 : vector<1x1x32x128xbf16> to vector<32x128xbf16>
    %33 = arith.extf %32 : vector<32x128xbf16> to vector<32x128xf32>
    %34 = vector.broadcast %30 : vector<32x1xf32> to vector<32x128xf32>
    %35 = arith.mulf %34, %33 : vector<32x128xf32>
    %36 = arith.addf %29, %35 : vector<32x128xf32>
    %37 = vector.extract_strided_slice %10 {offsets = [0, 0], sizes = [32, 1], strides = [1, 1]} : vector<32x4xf32> to vector<32x1xf32>
    %38 = vector.broadcast %37 : vector<32x1xf32> to vector<32x128xf32>
    %39 = arith.mulf %38, %36 : vector<32x128xf32>
    %40 = arith.addf %12, %39 : vector<32x128xf32>
    %41 = vector.extract_strided_slice %11 {offsets = [0, 2], sizes = [32, 2], strides = [1, 1]} : vector<32x8xf32> to vector<32x2xf32>
    %cst_15 = arith.constant dense<0xFF800000> : vector<32xf32>
    %42 = vector.multi_reduction <maximumf>, %41, %cst_15 [1] : vector<32x2xf32> to vector<32xf32>
    %43 = vector.shape_cast %42 : vector<32xf32> to vector<32x1xf32>
    %44 = vector.broadcast %43 : vector<32x1xf32> to vector<32x2xf32>
    %45 = arith.subf %41, %44 : vector<32x2xf32>
    %46 = math.exp %45 : vector<32x2xf32>
    %cst_16 = arith.constant dense<0.000000e+00> : vector<32xf32>
    %47 = vector.multi_reduction <add>, %46, %cst_16 [1] : vector<32x2xf32> to vector<32xf32>
    %48 = vector.shape_cast %47 : vector<32xf32> to vector<32x1xf32>
    %49 = tpu.reciprocal %48 {approx = true} : vector<32x1xf32> -> vector<32x1xf32>
    %50 = vector.broadcast %49 : vector<32x1xf32> to vector<32x2xf32>
    %51 = arith.mulf %46, %50 : vector<32x2xf32>
    %52 = vector.extract_strided_slice %51 {offsets = [0, 0], sizes = [32, 1], strides = [1, 1]} : vector<32x2xf32> to vector<32x1xf32>
    %c0_17 = arith.constant 0 : index
    %c1_18 = arith.constant 1 : index
    %c0_19 = arith.constant 0 : index
    %c0_20 = arith.constant 0 : index
    %53 = vector.load %arg3[%c0_17, %c1_18, %c0_19, %c0_20] : memref<2x4x32x128xbf16, #tpu.memory_space<vmem>>, vector<1x1x32x128xbf16>
    %54 = vector.shape_cast %53 : vector<1x1x32x128xbf16> to vector<32x128xbf16>
    %55 = arith.extf %54 : vector<32x128xbf16> to vector<32x128xf32>
    %56 = vector.broadcast %52 : vector<32x1xf32> to vector<32x128xf32>
    %57 = arith.mulf %56, %55 : vector<32x128xf32>
    %58 = vector.extract_strided_slice %51 {offsets = [0, 1], sizes = [32, 1], strides = [1, 1]} : vector<32x2xf32> to vector<32x1xf32>
    %c1_21 = arith.constant 1 : index
    %c1_22 = arith.constant 1 : index
    %c0_23 = arith.constant 0 : index
    %c0_24 = arith.constant 0 : index
    %59 = vector.load %arg3[%c1_21, %c1_22, %c0_23, %c0_24] : memref<2x4x32x128xbf16, #tpu.memory_space<vmem>>, vector<1x1x32x128xbf16>
    %60 = vector.shape_cast %59 : vector<1x1x32x128xbf16> to vector<32x128xbf16>
    %61 = arith.extf %60 : vector<32x128xbf16> to vector<32x128xf32>
    %62 = vector.broadcast %58 : vector<32x1xf32> to vector<32x128xf32>
    %63 = arith.mulf %62, %61 : vector<32x128xf32>
    %64 = arith.addf %57, %63 : vector<32x128xf32>
    %65 = vector.extract_strided_slice %10 {offsets = [0, 1], sizes = [32, 1], strides = [1, 1]} : vector<32x4xf32> to vector<32x1xf32>
    %66 = vector.broadcast %65 : vector<32x1xf32> to vector<32x128xf32>
    %67 = arith.mulf %66, %64 : vector<32x128xf32>
    %68 = arith.addf %40, %67 : vector<32x128xf32>
    %69 = vector.extract_strided_slice %11 {offsets = [0, 4], sizes = [32, 2], strides = [1, 1]} : vector<32x8xf32> to vector<32x2xf32>
    %cst_25 = arith.constant dense<0xFF800000> : vector<32xf32>
    %70 = vector.multi_reduction <maximumf>, %69, %cst_25 [1] : vector<32x2xf32> to vector<32xf32>
    %71 = vector.shape_cast %70 : vector<32xf32> to vector<32x1xf32>
    %72 = vector.broadcast %71 : vector<32x1xf32> to vector<32x2xf32>
    %73 = arith.subf %69, %72 : vector<32x2xf32>
    %74 = math.exp %73 : vector<32x2xf32>
    %cst_26 = arith.constant dense<0.000000e+00> : vector<32xf32>
    %75 = vector.multi_reduction <add>, %74, %cst_26 [1] : vector<32x2xf32> to vector<32xf32>
    %76 = vector.shape_cast %75 : vector<32xf32> to vector<32x1xf32>
    %77 = tpu.reciprocal %76 {approx = true} : vector<32x1xf32> -> vector<32x1xf32>
    %78 = vector.broadcast %77 : vector<32x1xf32> to vector<32x2xf32>
    %79 = arith.mulf %74, %78 : vector<32x2xf32>
    %80 = vector.extract_strided_slice %79 {offsets = [0, 0], sizes = [32, 1], strides = [1, 1]} : vector<32x2xf32> to vector<32x1xf32>
    %c0_27 = arith.constant 0 : index
    %c2 = arith.constant 2 : index
    %c0_28 = arith.constant 0 : index
    %c0_29 = arith.constant 0 : index
    %81 = vector.load %arg3[%c0_27, %c2, %c0_28, %c0_29] : memref<2x4x32x128xbf16, #tpu.memory_space<vmem>>, vector<1x1x32x128xbf16>
    %82 = vector.shape_cast %81 : vector<1x1x32x128xbf16> to vector<32x128xbf16>
    %83 = arith.extf %82 : vector<32x128xbf16> to vector<32x128xf32>
    %84 = vector.broadcast %80 : vector<32x1xf32> to vector<32x128xf32>
    %85 = arith.mulf %84, %83 : vector<32x128xf32>
    %86 = vector.extract_strided_slice %79 {offsets = [0, 1], sizes = [32, 1], strides = [1, 1]} : vector<32x2xf32> to vector<32x1xf32>
    %c1_30 = arith.constant 1 : index
    %c2_31 = arith.constant 2 : index
    %c0_32 = arith.constant 0 : index
    %c0_33 = arith.constant 0 : index
    %87 = vector.load %arg3[%c1_30, %c2_31, %c0_32, %c0_33] : memref<2x4x32x128xbf16, #tpu.memory_space<vmem>>, vector<1x1x32x128xbf16>
    %88 = vector.shape_cast %87 : vector<1x1x32x128xbf16> to vector<32x128xbf16>
    %89 = arith.extf %88 : vector<32x128xbf16> to vector<32x128xf32>
    %90 = vector.broadcast %86 : vector<32x1xf32> to vector<32x128xf32>
    %91 = arith.mulf %90, %89 : vector<32x128xf32>
    %92 = arith.addf %85, %91 : vector<32x128xf32>
    %93 = vector.extract_strided_slice %10 {offsets = [0, 2], sizes = [32, 1], strides = [1, 1]} : vector<32x4xf32> to vector<32x1xf32>
    %94 = vector.broadcast %93 : vector<32x1xf32> to vector<32x128xf32>
    %95 = arith.mulf %94, %92 : vector<32x128xf32>
    %96 = arith.addf %68, %95 : vector<32x128xf32>
    %97 = vector.extract_strided_slice %11 {offsets = [0, 6], sizes = [32, 2], strides = [1, 1]} : vector<32x8xf32> to vector<32x2xf32>
    %cst_34 = arith.constant dense<0xFF800000> : vector<32xf32>
    %98 = vector.multi_reduction <maximumf>, %97, %cst_34 [1] : vector<32x2xf32> to vector<32xf32>
    %99 = vector.shape_cast %98 : vector<32xf32> to vector<32x1xf32>
    %100 = vector.broadcast %99 : vector<32x1xf32> to vector<32x2xf32>
    %101 = arith.subf %97, %100 : vector<32x2xf32>
    %102 = math.exp %101 : vector<32x2xf32>
    %cst_35 = arith.constant dense<0.000000e+00> : vector<32xf32>
    %103 = vector.multi_reduction <add>, %102, %cst_35 [1] : vector<32x2xf32> to vector<32xf32>
    %104 = vector.shape_cast %103 : vector<32xf32> to vector<32x1xf32>
    %105 = tpu.reciprocal %104 {approx = true} : vector<32x1xf32> -> vector<32x1xf32>
    %106 = vector.broadcast %105 : vector<32x1xf32> to vector<32x2xf32>
    %107 = arith.mulf %102, %106 : vector<32x2xf32>
    %108 = vector.extract_strided_slice %107 {offsets = [0, 0], sizes = [32, 1], strides = [1, 1]} : vector<32x2xf32> to vector<32x1xf32>
    %c0_36 = arith.constant 0 : index
    %c3 = arith.constant 3 : index
    %c0_37 = arith.constant 0 : index
    %c0_38 = arith.constant 0 : index
    %109 = vector.load %arg3[%c0_36, %c3, %c0_37, %c0_38] : memref<2x4x32x128xbf16, #tpu.memory_space<vmem>>, vector<1x1x32x128xbf16>
    %110 = vector.shape_cast %109 : vector<1x1x32x128xbf16> to vector<32x128xbf16>
    %111 = arith.extf %110 : vector<32x128xbf16> to vector<32x128xf32>
    %112 = vector.broadcast %108 : vector<32x1xf32> to vector<32x128xf32>
    %113 = arith.mulf %112, %111 : vector<32x128xf32>
    %114 = vector.extract_strided_slice %107 {offsets = [0, 1], sizes = [32, 1], strides = [1, 1]} : vector<32x2xf32> to vector<32x1xf32>
    %c1_39 = arith.constant 1 : index
    %c3_40 = arith.constant 3 : index
    %c0_41 = arith.constant 0 : index
    %c0_42 = arith.constant 0 : index
    %115 = vector.load %arg3[%c1_39, %c3_40, %c0_41, %c0_42] : memref<2x4x32x128xbf16, #tpu.memory_space<vmem>>, vector<1x1x32x128xbf16>
    %116 = vector.shape_cast %115 : vector<1x1x32x128xbf16> to vector<32x128xbf16>
    %117 = arith.extf %116 : vector<32x128xbf16> to vector<32x128xf32>
    %118 = vector.broadcast %114 : vector<32x1xf32> to vector<32x128xf32>
    %119 = arith.mulf %118, %117 : vector<32x128xf32>
    %120 = arith.addf %113, %119 : vector<32x128xf32>
    %121 = vector.extract_strided_slice %10 {offsets = [0, 3], sizes = [32, 1], strides = [1, 1]} : vector<32x4xf32> to vector<32x1xf32>
    %122 = vector.broadcast %121 : vector<32x1xf32> to vector<32x128xf32>
    %123 = arith.mulf %122, %120 : vector<32x128xf32>
    %124 = arith.addf %96, %123 : vector<32x128xf32>
    %c0_43 = arith.constant 0 : index
    %c0_44 = arith.constant 0 : index
    %125 = vector.load %arg5[%c0_43, %c0_44] : memref<32x128xf32, #tpu.memory_space<vmem>>, vector<32x128xf32>
    tpu.vector_store %arg5[%c0_43, %c0_44], %124 {strides = array<i32>} : memref<32x128xf32, #tpu.memory_space<vmem>>, vector<32x128xf32>,
    return
  }
  func.func @transform_0(%arg0: i32) -> (i32, i32) {
    %c0_i32 = arith.constant 0 : i32
    %c0_i32_0 = arith.constant 0 : i32
    return %arg0, %c0_i32 : i32, i32
  }
  func.func @transform_1(%arg0: i32) -> (i32, i32) {
    %c0_i32 = arith.constant 0 : i32
    %c0_i32_0 = arith.constant 0 : i32
    return %arg0, %c0_i32 : i32, i32
  }
  func.func @transform_2(%arg0: i32) -> (i32, i32, i32, i32) {
    %c0_i32 = arith.constant 0 : i32
    %c0_i32_0 = arith.constant 0 : i32
    %c0_i32_1 = arith.constant 0 : i32
    %c0_i32_2 = arith.constant 0 : i32
    return %c0_i32, %c0_i32_0, %arg0, %c0_i32_1 : i32, i32, i32, i32
  }
  func.func @transform_3(%arg0: i32) -> (i32, i32) {
    %c0_i32 = arith.constant 0 : i32
    %c0_i32_0 = arith.constant 0 : i32
    return %arg0, %c0_i32 : i32, i32
  }
  func.func @transform_4(%arg0: i32) -> (i32, i32) {
    %c0_i32 = arith.constant 0 : i32
    %c0_i32_0 = arith.constant 0 : i32
    return %arg0, %c0_i32 : i32, i32
  }
}

</mosaic_0001>

<bundles_post_ra>
// kernel: main_model_forward.4
= control target key start
LH: loop header
LB: loop body
LE: loop exit
PB: predicated region body
PF: predicated region fallthrough
CT: control target
= control target key end

     0   :  { %v180_v0 = vmov 0.0   ;;  %vm181_vm0 = vmmov 0   ;;  %s230_s1 = inlined_call_operand.vmem [shape: bf16[128,128], index: 1, kind: input, shape index: {}]   ;;  %s231_s0 = inlined_call_operand.vmem [shape: bf16[16,128], index: 0, kind: input, shape index: {}]   ;;  %s232_s2 = inlined_call_operand.vmem [shape: f32[16,128], index: 2, kind: output, shape index: {}]  }
   0x1   :  { %149 = vmatprep.subr.bf16.mxu0 %v180_v0  ;;  %v171_v1 = vld [vmem:[%s230_s1 + $0x38] sm:$0xff]   ;;  %165 = vmatprep.mubr.msk.bf16.mxu0 %vm181_vm0, %v180_v0  ;;  %v172_v2 = vld [vmem:[%s230_s1 + $0x30] sm:$0xff]   ;;  %v173_v3 = vld [vmem:[%s230_s1 + $0x28] sm:$0xff]  }
   0x2   :  { %150 = vmatpush3.bf16.msra.mxu0 %v171_v1  ;;  %v174_v4 = vld [vmem:[%s230_s1 + $0x20] sm:$0xff]   ;;  %v175_v5 = vld [vmem:[%s230_s1 + $0x18] sm:$0xff]   ;;  %v176_v6 = vld [vmem:[%s230_s1 + $0x10] sm:$0xff]  }
   0x3   :  { %151 = vmatprep.subr.bf16.mxu0 %v180_v0  ;;  %v177_v7 = vld [vmem:[%s230_s1 + $0x8] sm:$0xff]   ;;  %v178_v8 = vld [vmem:[%s230_s1] sm:$0xff]  }
   0x4   :  { %v179_v9 = vld [vmem:[%s231_s0] sm:$0xff]  }
   0x6   :  { %152 = vmatpush3.bf16.msra.mxu0 %v172_v2 }
   0x7   :  { %153 = vmatprep.subr.bf16.mxu0 %v180_v0 }
   0xa   :  { %154 = vmatpush3.bf16.msra.mxu0 %v173_v3 }
   0xb   :  { %155 = vmatprep.subr.bf16.mxu0 %v180_v0 }
   0xe   :  { %156 = vmatpush3.bf16.msra.mxu0 %v174_v4 }
   0xf   :  { %157 = vmatprep.subr.bf16.mxu0 %v180_v0 }
  0x12   :  { %158 = vmatpush3.bf16.msra.mxu0 %v175_v5 }
  0x13   :  { %159 = vmatprep.subr.bf16.mxu0 %v180_v0 }
  0x16   :  { %160 = vmatpush3.bf16.msra.mxu0 %v176_v6 }
  0x17   :  { %161 = vmatprep.subr.bf16.mxu0 %v180_v0 }
  0x1a   :  { %162 = vmatpush3.bf16.msra.mxu0 %v177_v7 }
  0x1b   :  { %163 = vmatprep.subr.bf16.mxu0 %v180_v0 }
  0x1e   :  { %164 = vmatpush3.bf16.msra.mxu0 %v178_v8 }
  0x21   :  { %166 = vmatmul.mubr.bf16.vlgmr.msra.gmra.mxu0 %v179_v9 }
  0xe1   :  { %v118_v10 = vpop.f32.mrf.mxu0 }
  0xe2   :  { %125 = vst [vmem:[%s232_s2] sm:$0xff] %v118_v10 }
  0xe3   :  { %v167_v11 = vpop.f32.mrf.mxu0 }
  0xe5   :  { %v121_v12 = vpop.f32.mrf.mxu0 }
  0xe6   :  { %126 = vst [vmem:[%s232_s2 + $0x8] sm:$0xff] %v121_v12 }
  0xe7   :  { %v168_v13 = vpop.f32.mrf.mxu0 }

// kernel: main_model_forward.5
= control target key start
LH: loop header
LB: loop body
LE: loop exit
PB: predicated region body
PF: predicated region fallthrough
CT: control target
= control target key end

     0   :  { %vm19_vm0 = vcmask 31744   ;;  %s412_s0 = inlined_call_operand.vmem [shape: f32[32,4], index: 0, kind: input, shape index: {}]   ;;  %s413_s1 = inlined_call_operand.vmem [shape: bf16[4,32,128], index: 1, kind: input, shape index: {}]   ;;  %s414_s2 = inlined_call_operand.vmem [shape: f32[32,128], index: 2, kind: input, shape index: {}]   ;;  %s415_s3 = inlined_call_operand.hbm [shape: f32[32,128], index: 3, kind: output, shape index: {}]  }
   0x1   :  { %v15_v0 = vld [vmem:[%s412_s0] sm:$0xff]  ;;  %v17_v1 = vld [vmem:[%s412_s0 + $0x10] sm:$0xff]  ;;  %v16_v2 = vld [vmem:[%s412_s0 + $0x8] sm:$0xff] }
   0x2   :  { %v20_v3 = vsel %vm19_vm0, %v15_v0, -inf  ;;  %v26_v4 = vsel %vm19_vm0, %v17_v1, -inf  ;;  %v18_v5 = vld [vmem:[%s412_s0 + $0x18] sm:$0xff] }
   0x3   :  { %8 = vsyncpa [#allocation3], 0  ;;  %21 = vmax.xlane.f32.xlu0 %v20_v3  ;;  %27 = vmax.xlane.f32.xlu1 %v26_v4  ;;  %v23_v6 = vsel %vm19_vm0, %v16_v2, -inf  ;;  %v29_v7 = vsel %vm19_vm0, %v18_v5, -inf  ;;  %v326_v28 = vmov 0   ;;  %v327_v38 = vmov 2  }
   0x4   :  { %281 = vset.pattern.permute.xlu0 %v326_v28  ;;  %282 = vset.pattern.permute.xlu1 %v326_v28  ;;  %v328_v41 = vmov 3   ;;  %v329_v43 = vmov 1   ;;  %v236_v49 = vld [vmem:[%s413_s1] sm:$0xff]   ;;  %v268_v51 = vld [vmem:[%s413_s1 + $0x10] sm:$0xff]   ;;  %v267_v63 = vld [vmem:[%s413_s1 + $0x8] sm:$0xff]   ;;  %s330_s15 = smov [#allocation2]  }
   0x5   :  { %v237_v52 = vunpack.c.l.bf16 %v236_v49  ;;  %v245_v54 = vunpack.c.l.bf16 %v268_v51  ;;  %v64_v58 = vld [vmem:[%s414_s2] sm:$0xff]  ;;  %v272_v60 = vld [vmem:[%s413_s1 + $0x30] sm:$0xff]   ;;  %v238_v3 = vunpack.c.h.bf16 %v236_v49  ;;  %s212_s16 = sshll.u32 %s330_s15, 4  ;;  %s213_s16 = int_to_ptr.vmem [resolvable:$true] %s212_s16 }
   0x6   :  { %v270_v59 = vld [vmem:[%s413_s1 + $0x20] sm:$0xff]   ;;  %p309_p1 = scmp.lt.s32.totalorder %s213_s16, %s213_s16 }
   0x7   :  { %24 = vmax.xlane.f32.xlu0 %v23_v6  ;;  %30 = vmax.xlane.f32.xlu1 %v29_v7  ;;  %v253_v62 = vunpack.c.l.bf16 %v270_v59  ;;  %v254_v28 = vunpack.c.h.bf16 %v270_v59 }
  0x8c   :  { %v22_v8 = vpop.xlane.xlu0 %21  ;;  %v28_v9 = vpop.xlane.xlu1 %27 }
  0x8d   :  { %v32_v10 = vsub.f32 %v15_v0, %v22_v8  ;;  %v34_v11 = vsub.f32 %v17_v1, %v28_v9  ;;  %v261_v1 = vunpack.c.l.bf16 %v272_v60 }
  0x8f   :  { %v36_v12 = vmul.f32 1.442695, %v32_v10  ;;  %v40_v13 = vmul.f32 1.442695, %v34_v11  ;;  %v246_v10 = vunpack.c.h.bf16 %v268_v51 }
  0x90   :  { %v25_v14 = vpop.xlane.xlu0 %24  ;;  %v31_v15 = vpop.xlane.xlu1 %30 }
  0x91   :  { %288 = vpow2.f32 %v36_v12  ;;  %v33_v16 = vsub.f32 %v16_v2, %v25_v14  ;;  %v35_v17 = vsub.f32 %v18_v5, %v31_v15  ;;  %v242_v2 = vunpack.c.h.bf16 %v267_v63  ;;  %v269_v5 = vld [vmem:[%s413_s1 + $0x18] sm:$0xff]  }
  0x92   :  { %290 = vpow2.f32 %v40_v13  ;;  %v250_v8 = vunpack.c.h.bf16 %v269_v5  ;;  %v67_v15 = vld [vmem:[%s414_s2 + $0x18] sm:$0xff] }
  0x93   :  { %v38_v18 = vmul.f32 1.442695, %v33_v16  ;;  %v42_v19 = vmul.f32 1.442695, %v35_v17  ;;  %v273_v16 = vld [vmem:[%s413_s1 + $0x38] sm:$0xff]   ;;  %v271_v17 = vld [vmem:[%s413_s1 + $0x28] sm:$0xff]  }
  0x95   :  { %292 = vpow2.f32 %v38_v18 }
  0x96   :  { %294 = vpow2.f32 %v42_v19  ;;  %v65_v19 = vld [vmem:[%s414_s2 + $0x8] sm:$0xff] }
  0x9e   :  { %v289_v20 = vpop.eup %288 }
  0x9f   :  { %v291_v21 = vpop.eup %290  ;;  %v44_v22 = vsel %vm19_vm0, %v289_v20, 0.0 }
  0xa0   :  { %45 = vadd.xlane.f32.xlu0 %v44_v22  ;;  %v50_v23 = vsel %vm19_vm0, %v291_v21, 0.0  ;;  %v258_v22 = vunpack.c.h.bf16 %v271_v17 }
  0xa2   :  { %v293_v24 = vpop.eup %292 }
  0xa3   :  { %v295_v25 = vpop.eup %294  ;;  %v47_v26 = vsel %vm19_vm0, %v293_v24, 0.0 }
  0xa4   :  { %51 = vadd.xlane.f32.xlu0 %v50_v23  ;;  %48 = vadd.xlane.f32.xlu1 %v47_v26  ;;  %v53_v27 = vsel %vm19_vm0, %v295_v25, 0.0  ;;  %v241_v23 = vunpack.c.l.bf16 %v267_v63  ;;  %v266_v26 = vunpack.c.h.bf16 %v273_v16 }
  0xa8   :  { %54 = vadd.xlane.f32.xlu1 %v53_v27 }
 0x129   :  { %v46_v29 = vpop.xlane.xlu0 %45 }
 0x12a   :  { %296 = vrcp.f32 %v46_v29 }
 0x12d   :  { %v49_v30 = vpop.xlane.xlu1 %48  ;;  %v52_v31 = vpop.xlane.xlu0 %51 }
 0x12e   :  { %298 = vrcp.f32 %v49_v30  ;;  %v249_v30 = vunpack.c.l.bf16 %v269_v5 }
 0x12f   :  { %300 = vrcp.f32 %v52_v31 }
 0x131   :  { %v55_v32 = vpop.xlane.xlu1 %54 }
 0x132   :  { %302 = vrcp.f32 %v55_v32 }
 0x137   :  { %v297_v33 = vpop.eup %296 }
 0x138   :  { %v60_v34 = vmul.f32 %v297_v33, %v289_v20 }
 0x13a   :  { %78 = vperm.xlu0 %281, %v60_v34  }
 0x13b   :  { %v299_v35 = vpop.eup %298 }
 0x13c   :  { %v61_v36 = vmul.f32 %v299_v35, %v293_v24  ;;  %v301_v37 = vpop.eup %300 }
 0x13d   :  { %v62_v39 = vmul.f32 %v301_v37, %v291_v21  ;;  %v262_v37 = vunpack.c.h.bf16 %v272_v60 }
 0x13e   :  { %83 = vperm.xlu1 %282, %v61_v36   ;;  %285 = vset.pattern.permute.xlu0 %v327_v38 }
 0x13f   :  { %151 = vperm.xlu0 %285, %v61_v36   ;;  %v303_v40 = vpop.eup %302 }
 0x140   :  { %v63_v42 = vmul.f32 %v303_v40, %v295_v25 }
 0x142   :  { %88 = vperm.xlu1 %282, %v62_v39  }
 0x143   :  { %286 = vset.pattern.permute.xlu0 %v328_v41 }
 0x144   :  { %180 = vperm.xlu0 %286, %v60_v34  }
 0x146   :  { %93 = vperm.xlu1 %282, %v63_v42  }
 0x148   :  { %192 = vperm.xlu0 %286, %v63_v42  }
 0x14a   :  { %283 = vset.pattern.permute.xlu1 %v329_v43 }
 0x14b   :  { %114 = vperm.xlu1 %283, %v60_v34  }
 0x14f   :  { %118 = vperm.xlu1 %283, %v61_v36  }
 0x153   :  { %122 = vperm.xlu1 %283, %v62_v39  }
 0x157   :  { %126 = vperm.xlu1 %283, %v63_v42  }
 0x15b   :  { %284 = vset.pattern.permute.xlu1 %v327_v38  ;;  %v66_v38 = vld [vmem:[%s414_s2 + $0x10] sm:$0xff]  ;;  %s304_s2 = scalar_lea.vmem %s213_s16, 512 }
 0x15c   :  { %147 = vperm.xlu1 %284, %v60_v34   ;;  %p305_p0 = scmp.ne.s32.totalorder %s213_s16, %s304_s2  ;;  %p310_p2 = scmp.lt.s32.totalorder %s304_s2, %s304_s2 }
 0x15e   :  { %p311_p3 = por %p310_p2, %p309_p1 }
 0x160   :  { %155 = vperm.xlu1 %284, %v62_v39   ;;  %p312_p4 = pnand %p311_p3, %p305_p0 }
 0x164   :  { %159 = vperm.xlu1 %284, %v63_v42  }
 0x168   :  { %287 = vset.pattern.permute.xlu1 %v328_v41 }
 0x169   :  { %184 = vperm.xlu1 %287, %v61_v36   ;;  %v257_v36 = vunpack.c.l.bf16 %v271_v17 }
 0x16d   :  { %188 = vperm.xlu1 %287, %v62_v39  }
 0x1b5   :  { %v79_v50 = vpop.permute.xlu0 %78 }
 0x1b6   :  { %v96_v56 = vmul.f32 %v237_v52, %v79_v50 }
 0x1b8   :  { %v100_v0 = vadd.f32 %v96_v56, %v64_v58 }
 0x1b9   :  { %v84_v44 = vpop.permute.xlu1 %83 }
 0x1ba   :  { %v152_v55 = vpop.permute.xlu0 %151  ;;  %v97_v14 = vmul.f32 %v238_v3, %v84_v44 }
 0x1bb   :  { %v163_v41 = vmul.f32 %v254_v28, %v152_v55 }
 0x1bc   :  { %v101_v27 = vadd.f32 %v97_v14, %v65_v19 }
 0x1bd   :  { %v89_v45 = vpop.permute.xlu1 %88 }
 0x1be   :  { %v98_v34 = vmul.f32 %v241_v23, %v89_v45 }
 0x1bf   :  { %v181_v4 = vpop.permute.xlu0 %180 }
 0x1c0   :  { %v195_v11 = vmul.f32 %v261_v1, %v181_v4 }
 0x1c1   :  { %v94_v46 = vpop.permute.xlu1 %93 }
 0x1c2   :  { %v99_v12 = vmul.f32 %v242_v2, %v94_v46  ;;  %v265_v46 = vunpack.c.l.bf16 %v273_v16 }
 0x1c3   :  { %v193_v29 = vpop.permute.xlu0 %192 }
 0x1c4   :  { %v103_v25 = vadd.f32 %v99_v12, %v67_v15  ;;  %v198_v39 = vmul.f32 %v266_v26, %v193_v29 }
 0x1c6   :  { %v115_v47 = vpop.permute.xlu1 %114 }
 0x1c7   :  { %v129_v61 = vmul.f32 %v245_v54, %v115_v47  ;;  %v102_v47 = vadd.f32 %v98_v34, %v66_v38 }
 0x1c9   :  { %v133_v7 = vadd.f32 %v129_v61, %v100_v0 }
 0x1ca   :  { %v119_v48 = vpop.permute.xlu1 %118 }
 0x1cb   :  { %v130_v24 = vmul.f32 %v246_v10, %v119_v48 }
 0x1cd   :  { %v134_v35 = vadd.f32 %v130_v24, %v101_v27 }
 0x1ce   :  { %v123_v53 = vpop.permute.xlu1 %122 }
 0x1cf   :  { %v131_v42 = vmul.f32 %v249_v30, %v123_v53  ;;  %v167_v49 = vadd.f32 %v163_v41, %v134_v35 }
 0x1d1   :  { %v135_v45 = vadd.f32 %v131_v42, %v102_v47 }
 0x1d2   :  { %v127_v57 = vpop.permute.xlu1 %126 }
 0x1d3   :  { %v132_v20 = vmul.f32 %v250_v8, %v127_v57 }
 0x1d5   :  { %v136_v32 = vadd.f32 %v132_v20, %v103_v25 }
 0x1d7   :  { %v148_v6 = vpop.permute.xlu1 %147 }
 0x1d8   :  { %v162_v9 = vmul.f32 %v253_v62, %v148_v6 }
 0x1da   :  { %v166_v13 = vadd.f32 %v162_v9, %v133_v7 }
 0x1db   :  { %v156_v18 = vpop.permute.xlu1 %155 }
 0x1dc   :  { %v199_v21 = vadd.f32 %v195_v11, %v166_v13  ;;  %v164_v48 = vmul.f32 %v257_v36, %v156_v18 }
 0x1de   :  { %203 = vst [vmem:[#allocation2] sm:$0xff] %v199_v21  ;;  %v168_v54 = vadd.f32 %v164_v48, %v135_v45 }
 0x1df   :  { %v160_v31 = vpop.permute.xlu1 %159 }
 0x1e0   :  { %v165_v33 = vmul.f32 %v258_v22, %v160_v31 }
 0x1e2   :  { %v169_v40 = vadd.f32 %v165_v33, %v136_v32 }
 0x1e4   :  { %v202_v43 = vadd.f32 %v198_v39, %v169_v40  ;;  %v185_v44 = vpop.permute.xlu1 %184 }
 0x1e5   :  { %v196_v50 = vmul.f32 %v262_v37, %v185_v44 }
 0x1e6   :  { %206 = vst [vmem:[#allocation2 + $0x18] sm:$0xff] %v202_v43 }
 0x1e7   :  { %v200_v51 = vadd.f32 %v196_v50, %v167_v49 }
 0x1e8   :  { %v189_v52 = vpop.permute.xlu1 %188 }
 0x1e9   :  { %204 = vst [vmem:[#allocation2 + $0x8] sm:$0xff] %v200_v51  ;;  %v197_v56 = vmul.f32 %v265_v46, %v189_v52 }
 0x1eb   :  { %v201_v57 = vadd.f32 %v197_v56, %v168_v54 }
 0x1ed   :  { %205 = vst [vmem:[#allocation2 + $0x10] sm:$0xff] %v201_v57 }
 0x1ee   :  { %315 = shalt.err (!%p312_p4)
}
 0x1ef   :  { %s331_s17 = smov 128   ;;  %s332_s18 = smov 8  }
 0x1f0   :  { %218 = dma.vmem_to_hbm [thread:$0]  %s213_s16, 512, %s415_s3, [#allocation3], %s331_s17, %s331_s17, %s332_s18  }
 0x1f1   :  { %324 = dma.done.wait [#allocation3], 512  }
 0x1f2   :  { %325 = vsyncadd [#allocation3], 4294966784 }
 0x1f3   :  { %222 = vsyncpa [#allocation3], 1 }

// kernel: main_model_forward.6
= control target key start
LH: loop header
LB: loop body
LE: loop exit
PB: predicated region body
PF: predicated region fallthrough
CT: control target
= control target key end

     0   :  { %s256_s1 = inlined_call_operand.vmem [shape: bf16[128,128], index: 1, kind: input, shape index: {}]   ;;  %s257_s0 = inlined_call_operand.vmem [shape: bf16[32,128], index: 0, kind: input, shape index: {}]   ;;  %s258_s2 = inlined_call_operand.vmem [shape: f32[32,128], index: 2, kind: output, shape index: {}]  }
   0x1   :  { %v189_v0 = vld [vmem:[%s256_s1 + $0x38] sm:$0xff]   ;;  %v190_v1 = vld [vmem:[%s256_s1 + $0x30] sm:$0xff]   ;;  %v191_v2 = vld [vmem:[%s256_s1 + $0x28] sm:$0xff]  }
   0x2   :  { %169 = vmatprep.subr.bf16.mxu0 %v189_v0  ;;  %v192_v3 = vld [vmem:[%s256_s1 + $0x20] sm:$0xff]   ;;  %v193_v5 = vld [vmem:[%s256_s1 + $0x18] sm:$0xff]   ;;  %v194_v6 = vld [vmem:[%s256_s1 + $0x10] sm:$0xff]  }
   0x3   :  { %170 = vmatpush3.bf16.msra.mxu0 %v189_v0  ;;  %v197_v4 = vld [vmem:[%s257_s0] sm:$0xff]   ;;  %v195_v7 = vld [vmem:[%s256_s1 + $0x8] sm:$0xff]  }
   0x4   :  { %171 = vmatprep.subr.bf16.mxu0 %v190_v1  ;;  %185 = vmatprep.mubr.bf16.mxu0 %v197_v4  ;;  %v196_v8 = vld [vmem:[%s256_s1] sm:$0xff]   ;;  %v198_v9 = vld [vmem:[%s257_s0 + $0x8] sm:$0xff]  }
   0x7   :  { %172 = vmatpush3.bf16.msra.mxu0 %v190_v1 }
   0x8   :  { %173 = vmatprep.subr.bf16.mxu0 %v191_v2 }
   0xb   :  { %174 = vmatpush3.bf16.msra.mxu0 %v191_v2 }
   0xc   :  { %175 = vmatprep.subr.bf16.mxu0 %v192_v3 }
   0xf   :  { %176 = vmatpush3.bf16.msra.mxu0 %v192_v3 }
  0x10   :  { %177 = vmatprep.subr.bf16.mxu0 %v193_v5 }
  0x13   :  { %178 = vmatpush3.bf16.msra.mxu0 %v193_v5 }
  0x14   :  { %179 = vmatprep.subr.bf16.mxu0 %v194_v6 }
  0x17   :  { %180 = vmatpush3.bf16.msra.mxu0 %v194_v6 }
  0x18   :  { %181 = vmatprep.subr.bf16.mxu0 %v195_v7 }
  0x1b   :  { %182 = vmatpush3.bf16.msra.mxu0 %v195_v7 }
  0x1c   :  { %183 = vmatprep.subr.bf16.mxu0 %v196_v8 }
  0x1f   :  { %184 = vmatpush3.bf16.msra.mxu0 %v196_v8 }
  0x22   :  { %186 = vmatmul.mubr.bf16.vlgmr.msra.gmra.mxu0 %v198_v9 }
  0xe2   :  { %v187_v10 = vpop.f32.mrf.mxu0 }
  0xe3   :  { %143 = vst [vmem:[%s258_s2 + $0x10] sm:$0xff] %v187_v10 }
  0xe4   :  { %v126_v11 = vpop.f32.mrf.mxu0 }
  0xe5   :  { %141 = vst [vmem:[%s258_s2] sm:$0xff] %v126_v11 }
  0xe6   :  { %v188_v12 = vpop.f32.mrf.mxu0 }
  0xe7   :  { %144 = vst [vmem:[%s258_s2 + $0x18] sm:$0xff] %v188_v12 }
  0xe8   :  { %v129_v13 = vpop.f32.mrf.mxu0 }
  0xe9   :  { %142 = vst [vmem:[%s258_s2 + $0x8] sm:$0xff] %v129_v13 }

// kernel: main_model_forward.7
= control target key start
LH: loop header
LB: loop body
LE: loop exit
PB: predicated region body
PF: predicated region fallthrough
CT: control target
= control target key end

     0   :  { %vm22_vm0 = vcmask 31744   ;;  %s1319_s0 = inlined_call_operand.vmem [shape: f32[32,8], index: 0, kind: input, shape index: {}]   ;;  %s1320_s1 = inlined_call_operand.vmem [shape: f32[32,4], index: 1, kind: input, shape index: {}]   ;;  %s1321_s2 = inlined_call_operand.vmem [shape: bf16[2,4,32,128], index: 2, kind: input, shape index: {}]   ;;  %s1322_s3 = inlined_call_operand.vmem [shape: f32[32,128], index: 3, kind: input, shape index: {}]   ;;  %s1323_s4 = inlined_call_operand.hbm [shape: f32[32,128], index: 4, kind: output, shape index: {}]  }
   0x1   :  { %v971_v0 = vld [vmem:[%s1320_s1 + $0x10] sm:$0xff]  ;;  %v976_v1 = vld [vmem:[%s1320_s1] sm:$0xff]  ;;  %v981_v2 = vld [vmem:[%s1320_s1 + $0x18] sm:$0xff] }
   0x2   :  { %v29_v3 = vsel %vm22_vm0, %v971_v0, -inf  ;;  %v23_v4 = vsel %vm22_vm0, %v976_v1, -inf  ;;  %v990_v5 = vld [vmem:[%s1320_s1 + $0x8] sm:$0xff]  ;;  %v32_v6 = vsel %vm22_vm0, %v981_v2, -inf }
   0x3   :  { %30 = vmax.xlane.f32.xlu1 %v29_v3  ;;  %24 = vmax.xlane.f32.xlu0 %v23_v4  ;;  %v26_v7 = vsel %vm22_vm0, %v990_v5, -inf }
   0x4   :  { %9 = vsyncpa [#allocation3], 0  ;;  %v999_v8 = vld [vmem:[%s1319_s0 + $0x8] sm:$0xff]  ;;  %vm75_vm1 = vcmask 15360   ;;  %v1004_v9 = vld [vmem:[%s1319_s0] sm:$0xff]  ;;  %vm213_vm2 = vcmask 31760  }
   0x5   :  { %v79_v10 = vsel %vm75_vm1, %v999_v8, -inf  ;;  %v76_v11 = vsel %vm75_vm1, %v1004_v9, -inf  ;;  %v1013_v12 = vld [vmem:[%s1319_s0 + $0x18] sm:$0xff]  ;;  %v1018_v13 = vld [vmem:[%s1319_s0 + $0x10] sm:$0xff]  ;;  %v214_v16 = vsel %vm213_vm2, %v1004_v9, -inf  ;;  %v217_v17 = vsel %vm213_vm2, %v999_v8, -inf }
   0x6   :  { %v85_v14 = vsel %vm75_vm1, %v1013_v12, -inf  ;;  %v82_v15 = vsel %vm75_vm1, %v1018_v13, -inf  ;;  %v223_v18 = vsel %vm213_vm2, %v1013_v12, -inf  ;;  %v220_v19 = vsel %vm213_vm2, %v1018_v13, -inf  ;;  %s929_s0 = smov 126   ;;  %s930_s30 = smov 124  }
   0x7   :  { %33 = vmax.xlane.f32.xlu1 %v32_v6  ;;  %27 = vmax.xlane.f32.xlu0 %v26_v7  ;;  %vm364_vm3 = vcmask 48160   ;;  %vm515_vm4 = vcmask 64560   ;;  %s931_s5 = smov 122  }
   0x8   :  { %v365_v20 = vsel %vm364_vm3, %v1004_v9, -inf  ;;  %v368_v21 = vsel %vm364_vm3, %v999_v8, -inf  ;;  %v371_v22 = vsel %vm364_vm3, %v1018_v13, -inf  ;;  %v374_v23 = vsel %vm364_vm3, %v1013_v12, -inf }
   0x9   :  { %v516_v24 = vsel %vm515_vm4, %v1004_v9, -inf  ;;  %v519_v25 = vsel %vm515_vm4, %v999_v8, -inf  ;;  %v522_v26 = vsel %vm515_vm4, %v1018_v13, -inf  ;;  %v525_v27 = vsel %vm515_vm4, %v1013_v12, -inf }
   0xb   :  { %80 = vmax.xlane.f32.xlu1 %v79_v10  ;;  %77 = vmax.xlane.f32.xlu0 %v76_v11 }
   0xf   :  { %86 = vmax.xlane.f32.xlu1 %v85_v14  ;;  %83 = vmax.xlane.f32.xlu0 %v82_v15 }
  0x13   :  { %215 = vmax.xlane.f32.xlu1 %v214_v16  ;;  %218 = vmax.xlane.f32.xlu0 %v217_v17 }
  0x17   :  { %224 = vmax.xlane.f32.xlu1 %v223_v18  ;;  %221 = vmax.xlane.f32.xlu0 %v220_v19 }
  0x1b   :  { %366 = vmax.xlane.f32.xlu1 %v365_v20 }
  0x1f   :  { %369 = vmax.xlane.f32.xlu1 %v368_v21 }
  0x23   :  { %372 = vmax.xlane.f32.xlu1 %v371_v22 }
  0x27   :  { %375 = vmax.xlane.f32.xlu1 %v374_v23 }
  0x2b   :  { %517 = vmax.xlane.f32.xlu1 %v516_v24 }
  0x2f   :  { %520 = vmax.xlane.f32.xlu1 %v519_v25 }
  0x33   :  { %523 = vmax.xlane.f32.xlu1 %v522_v26 }
  0x37   :  { %526 = vmax.xlane.f32.xlu1 %v525_v27 }
  0x8c   :  { %v1036_v28 = vpop.xlane.xlu1 %30  ;;  %v1038_v29 = vpop.xlane.xlu0 %24 }
  0x90   :  { %v1040_v30 = vpop.xlane.xlu1 %33  ;;  %v1042_v31 = vpop.xlane.xlu0 %27 }
  0x94   :  { %v1044_v32 = vpop.xlane.xlu1 %80  ;;  %v1046_v33 = vpop.xlane.xlu0 %77 }
  0x98   :  { %v1048_v34 = vpop.xlane.xlu1 %86  ;;  %v1050_v35 = vpop.xlane.xlu0 %83 }
  0x9c   :  { %v216_v36 = vpop.xlane.xlu1 %215  ;;  %v219_v37 = vpop.xlane.xlu0 %218 }
  0x9d   :  { %v226_v38 = vsub.f32 %v1004_v9, %v216_v36  ;;  %v227_v39 = vsub.f32 %v999_v8, %v219_v37  ;;  %v35_v36 = vsub.f32 %v976_v1, %v1038_v29  ;;  %v37_v37 = vsub.f32 %v971_v0, %v1036_v28 }
  0x9e   :  { %v38_v1 = vsub.f32 %v981_v2, %v1040_v30 }
  0x9f   :  { %v230_v40 = vmul.f32 1.442695, %v226_v38  ;;  %v232_v41 = vmul.f32 1.442695, %v227_v39  ;;  %v39_v38 = vmul.f32 1.442695, %v35_v36 }
  0xa0   :  { %v225_v42 = vpop.xlane.xlu1 %224  ;;  %v222_v43 = vpop.xlane.xlu0 %221  ;;  %v43_v39 = vmul.f32 1.442695, %v37_v37  ;;  %v45_v28 = vmul.f32 1.442695, %v38_v1 }
  0xa1   :  { %827 = vpow2.f32 %v230_v40  ;;  %v229_v44 = vsub.f32 %v1013_v12, %v225_v42  ;;  %v228_v45 = vsub.f32 %v1018_v13, %v222_v43  ;;  %v88_v40 = vsub.f32 %v1004_v9, %v1046_v33 }
  0xa2   :  { %829 = vpow2.f32 %v232_v41  ;;  %v36_v41 = vsub.f32 %v990_v5, %v1042_v31  ;;  %v90_v43 = vsub.f32 %v1018_v13, %v1050_v35  ;;  %v91_v31 = vsub.f32 %v1013_v12, %v1048_v34 }
  0xa3   :  { %v236_v46 = vmul.f32 1.442695, %v229_v44  ;;  %v234_v47 = vmul.f32 1.442695, %v228_v45  ;;  %v92_v42 = vmul.f32 1.442695, %v88_v40  ;;  %v89_v44 = vsub.f32 %v999_v8, %v1044_v32 }
  0xa4   :  { %v367_v48 = vpop.xlane.xlu1 %366  ;;  %v41_v29 = vmul.f32 1.442695, %v36_v41  ;;  %v96_v0 = vmul.f32 1.442695, %v90_v43  ;;  %v98_v30 = vmul.f32 1.442695, %v91_v31 }
  0xa5   :  { %831 = vpow2.f32 %v236_v46  ;;  %v377_v49 = vsub.f32 %v1004_v9, %v367_v48  ;;  %v94_v5 = vmul.f32 1.442695, %v89_v44 }
  0xa6   :  { %833 = vpow2.f32 %v234_v47 }
  0xa7   :  { %v381_v50 = vmul.f32 1.442695, %v377_v49 }
  0xa8   :  { %v370_v51 = vpop.xlane.xlu1 %369 }
  0xa9   :  { %835 = vpow2.f32 %v381_v50  ;;  %v378_v52 = vsub.f32 %v999_v8, %v370_v51 }
  0xab   :  { %v383_v53 = vmul.f32 1.442695, %v378_v52  ;;  %v932_v52 = vmov 0  }
  0xac   :  { %v373_v54 = vpop.xlane.xlu1 %372  ;;  %807 = vset.pattern.permute.xlu0 %v932_v52  ;;  %808 = vset.pattern.permute.xlu1 %v932_v52 }
  0xad   :  { %837 = vpow2.f32 %v383_v53  ;;  %v379_v55 = vsub.f32 %v1018_v13, %v373_v54 }
  0xae   :  { %v1059_v56 = vpop.eup %827 }
  0xaf   :  { %v1061_v57 = vpop.eup %829  ;;  %v385_v58 = vmul.f32 1.442695, %v379_v55  ;;  %242 = vrot.lane.b32.xlu0 %v1059_v56, %s929_s0 }
  0xb0   :  { %244 = vrot.lane.b32.xlu1 %v1061_v57, %s929_s0  ;;  %v376_v59 = vpop.xlane.xlu1 %375 }
  0xb1   :  { %839 = vpow2.f32 %v385_v58  ;;  %v380_v60 = vsub.f32 %v1013_v12, %v376_v59 }
  0xb2   :  { %v1066_v61 = vpop.eup %831 }
  0xb3   :  { %v1068_v62 = vpop.eup %833  ;;  %v387_v63 = vmul.f32 1.442695, %v380_v60  ;;  %248 = vrot.lane.b32.xlu0 %v1066_v61, %s929_s0 }
  0xb4   :  { %246 = vrot.lane.b32.xlu1 %v1068_v62, %s929_s0  ;;  %v518_v3 = vpop.xlane.xlu1 %517 }
  0xb5   :  { %841 = vpow2.f32 %v387_v63  ;;  %v528_v4 = vsub.f32 %v1004_v9, %v518_v3 }
  0xb6   :  { %v1073_v6 = vpop.eup %835 }
  0xb7   :  { %v532_v7 = vmul.f32 1.442695, %v528_v4 }
  0xb8   :  { %393 = vrot.lane.b32.xlu1 %v1073_v6, %s930_s30  ;;  %v521_v10 = vpop.xlane.xlu1 %520 }
  0xb9   :  { %843 = vpow2.f32 %v532_v7  ;;  %v529_v11 = vsub.f32 %v999_v8, %v521_v10 }
  0xba   :  { %v1077_v14 = vpop.eup %837 }
  0xbb   :  { %v534_v15 = vmul.f32 1.442695, %v529_v11 }
  0xbc   :  { %395 = vrot.lane.b32.xlu1 %v1077_v14, %s930_s30  ;;  %v524_v16 = vpop.xlane.xlu1 %523 }
  0xbd   :  { %845 = vpow2.f32 %v534_v15  ;;  %v530_v17 = vsub.f32 %v1018_v13, %v524_v16 }
  0xbe   :  { %v1081_v18 = vpop.eup %839 }
  0xbf   :  { %v536_v19 = vmul.f32 1.442695, %v530_v17  ;;  %397 = vrot.lane.b32.xlu0 %v1081_v18, %s930_s30 }
  0xc0   :  { %v527_v20 = vpop.xlane.xlu1 %526 }
  0xc1   :  { %847 = vpow2.f32 %v536_v19  ;;  %v531_v21 = vsub.f32 %v1013_v12, %v527_v20 }
  0xc2   :  { %v1085_v22 = vpop.eup %841 }
  0xc3   :  { %v538_v23 = vmul.f32 1.442695, %v531_v21  ;;  %399 = vrot.lane.b32.xlu1 %v1085_v22, %s930_s30 }
  0xc5   :  { %849 = vpow2.f32 %v538_v23 }
  0xc6   :  { %v1088_v24 = vpop.eup %843  ;;  %851 = vpow2.f32 %v39_v38 }
  0xc7   :  { %544 = vrot.lane.b32.xlu0 %v1088_v24, %s931_s5  ;;  %853 = vpow2.f32 %v43_v39 }
  0xc8   :  { %855 = vpow2.f32 %v92_v42 }
  0xc9   :  { %857 = vpow2.f32 %v41_v29 }
  0xca   :  { %v1091_v25 = vpop.eup %845  ;;  %859 = vpow2.f32 %v96_v0 }
  0xcb   :  { %546 = vrot.lane.b32.xlu1 %v1091_v25, %s931_s5  ;;  %861 = vpow2.f32 %v45_v28 }
  0xcc   :  { %863 = vpow2.f32 %v94_v5 }
  0xcd   :  { %865 = vpow2.f32 %v98_v30 }
  0xce   :  { %v1094_v26 = vpop.eup %847 }
  0xcf   :  { %548 = vrot.lane.b32.xlu0 %v1094_v26, %s931_s5 }
  0xd2   :  { %v1097_v27 = vpop.eup %849 }
  0xd3   :  { %550 = vrot.lane.b32.xlu1 %v1097_v27, %s931_s5  ;;  %v1114_v9 = vpop.eup %851 }
  0xd4   :  { %v47_v13 = vsel %vm22_vm0, %v1114_v9, 0.0  ;;  %v1120_v2 = vpop.eup %853 }
  0xd5   :  { %v53_v33 = vsel %vm22_vm0, %v1120_v2, 0.0  ;;  %v1124_v8 = vpop.eup %855 }
  0xd6   :  { %v1126_v32 = vpop.eup %857  ;;  %v100_v12 = vsel %vm75_vm1, %v1124_v8, 0.0 }
  0xd7   :  { %v1130_v34 = vpop.eup %859  ;;  %v50_v35 = vsel %vm22_vm0, %v1126_v32, 0.0 }
  0xd8   :  { %v1134_v45 = vpop.eup %861  ;;  %v106_v46 = vsel %vm75_vm1, %v1130_v34, 0.0 }
  0xd9   :  { %v56_v47 = vsel %vm22_vm0, %v1134_v45, 0.0  ;;  %v1140_v48 = vpop.eup %863 }
  0xda   :  { %v103_v49 = vsel %vm75_vm1, %v1140_v48, 0.0  ;;  %v1144_v50 = vpop.eup %865 }
  0xdb   :  { %v109_v51 = vsel %vm75_vm1, %v1144_v50, 0.0 }
  0xee   :  { %48 = vadd.xlane.f32.xlu0 %v47_v13 }
  0xf2   :  { %54 = vadd.xlane.f32.xlu0 %v53_v33 }
  0xf6   :  { %101 = vadd.xlane.f32.xlu0 %v100_v12 }
  0xf7   :  { %51 = vadd.xlane.f32.xlu1 %v50_v35 }
  0xfa   :  { %107 = vadd.xlane.f32.xlu0 %v106_v46 }
  0xfb   :  { %57 = vadd.xlane.f32.xlu1 %v56_v47 }
  0xff   :  { %104 = vadd.xlane.f32.xlu1 %v103_v49 }
 0x103   :  { %110 = vadd.xlane.f32.xlu1 %v109_v51 }
 0x121   :  { %v243_v53 = vpop.permute.xlu0 %242 }
 0x122   :  { %v245_v54 = vpop.permute.xlu1 %244  ;;  %v254_v55 = vsel %vm75_vm1, %v243_v53, 0.0  ;;  %v933_v53 = vmov 1  }
 0x123   :  { %v257_v58 = vsel %vm75_vm1, %v245_v54, 0.0  ;;  %255 = vadd.xlane.f32.xlu1 %v254_v55 }
 0x124   :  { %258 = vadd.xlane.f32.xlu0 %v257_v58 }
 0x125   :  { %v249_v59 = vpop.permute.xlu0 %248 }
 0x126   :  { %v247_v60 = vpop.permute.xlu1 %246  ;;  %v263_v63 = vsel %vm75_vm1, %v249_v59, 0.0 }
 0x127   :  { %v260_v3 = vsel %vm75_vm1, %v247_v60, 0.0  ;;  %264 = vadd.xlane.f32.xlu1 %v263_v63 }
 0x128   :  { %261 = vadd.xlane.f32.xlu0 %v260_v3 }
 0x12a   :  { %v394_v4 = vpop.permute.xlu1 %393 }
 0x12b   :  { %v405_v7 = vsel %vm75_vm1, %v394_v4, 0.0 }
 0x12c   :  { %406 = vadd.xlane.f32.xlu1 %v405_v7 }
 0x12e   :  { %v396_v10 = vpop.permute.xlu1 %395 }
 0x12f   :  { %v408_v11 = vsel %vm75_vm1, %v396_v10, 0.0 }
 0x130   :  { %409 = vadd.xlane.f32.xlu0 %v408_v11 }
 0x131   :  { %v398_v15 = vpop.permute.xlu0 %397 }
 0x132   :  { %v411_v16 = vsel %vm75_vm1, %v398_v15, 0.0 }
 0x134   :  { %412 = vadd.xlane.f32.xlu0 %v411_v16 }
 0x135   :  { %v400_v17 = vpop.permute.xlu1 %399 }
 0x136   :  { %v414_v19 = vsel %vm75_vm1, %v400_v17, 0.0  ;;  %v935_v17 = vmov 3  }
 0x138   :  { %415 = vadd.xlane.f32.xlu0 %v414_v19 }
 0x139   :  { %v545_v20 = vpop.permute.xlu0 %544 }
 0x13a   :  { %v556_v21 = vsel %vm75_vm1, %v545_v20, 0.0  ;;  %v936_v20 = vmov 4  }
 0x13c   :  { %557 = vadd.xlane.f32.xlu0 %v556_v21 }
 0x13d   :  { %v547_v23 = vpop.permute.xlu1 %546 }
 0x13e   :  { %v559_v36 = vsel %vm75_vm1, %v547_v23, 0.0 }
 0x140   :  { %560 = vadd.xlane.f32.xlu0 %v559_v36 }
 0x141   :  { %v549_v37 = vpop.permute.xlu0 %548 }
 0x142   :  { %v562_v38 = vsel %vm75_vm1, %v549_v37, 0.0 }
 0x144   :  { %563 = vadd.xlane.f32.xlu0 %v562_v38 }
 0x145   :  { %v551_v39 = vpop.permute.xlu1 %550 }
 0x146   :  { %v565_v40 = vsel %vm75_vm1, %v551_v39, 0.0 }
 0x148   :  { %566 = vadd.xlane.f32.xlu0 %v565_v40 }
 0x177   :  { %v49_v41 = vpop.xlane.xlu0 %48 }
 0x17b   :  { %v55_v42 = vpop.xlane.xlu0 %54 }
 0x17f   :  { %v102_v43 = vpop.xlane.xlu0 %101 }
 0x180   :  { %867 = vrcp.f32 %v102_v43  ;;  %v52_v1 = vpop.xlane.xlu1 %51 }
 0x181   :  { %869 = vrcp.f32 %v52_v1 }
 0x183   :  { %v108_v0 = vpop.xlane.xlu0 %107 }
 0x184   :  { %v58_v29 = vpop.xlane.xlu1 %57 }
 0x185   :  { %871 = vrcp.f32 %v58_v29 }
 0x188   :  { %v105_v28 = vpop.xlane.xlu1 %104 }
 0x189   :  { %873 = vrcp.f32 %v105_v28 }
 0x18a   :  { %875 = vrcp.f32 %v49_v41 }
 0x18b   :  { %877 = vrcp.f32 %v108_v0 }
 0x18c   :  { %v111_v44 = vpop.xlane.xlu1 %110 }
 0x18d   :  { %v868_v5 = vpop.eup %867  ;;  %879 = vrcp.f32 %v111_v44 }
 0x18e   :  { %v116_v31 = vmul.f32 %v868_v5, %v1124_v8  ;;  %v870_v13 = vpop.eup %869  ;;  %881 = vrcp.f32 %v55_v42  ;;  %v715_v5 = vld [vmem:[%s1321_s2] sm:$0xff]  }
 0x18f   :  { %v1164_v30 = vmul.f32 %v870_v13, %v1126_v32  ;;  %v717_v13 = vunpack.c.h.bf16 %v715_v5 }
 0x190   :  { %130 = vperm.xlu0 %807, %v116_v31  }
 0x192   :  { %v872_v33 = vpop.eup %871 }
 0x193   :  { %v1168_v35 = vmul.f32 %v872_v33, %v1134_v45  ;;  %v780_v33 = vld [vmem:[%s1321_s2 + $0x48] sm:$0xff]  }
 0x194   :  { %192 = vperm.xlu0 %807, %v1164_v30  }
 0x196   :  { %v874_v12 = vpop.eup %873 }
 0x197   :  { %v876_v46 = vpop.eup %875  ;;  %v117_v47 = vmul.f32 %v874_v12, %v1140_v48 }
 0x198   :  { %v878_v49 = vpop.eup %877  ;;  %202 = vperm.xlu0 %807, %v1168_v35   ;;  %v1173_v8 = vmul.f32 %v876_v46, %v1114_v9  ;;  %v934_v9 = vmov 2  }
 0x199   :  { %135 = vperm.xlu1 %808, %v117_v47   ;;  %v118_v32 = vmul.f32 %v878_v49, %v1130_v34 }
 0x19a   :  { %v880_v51 = vpop.eup %879 }
 0x19b   :  { %v119_v45 = vmul.f32 %v880_v51, %v1144_v50  ;;  %v882_v50 = vpop.eup %881 }
 0x19c   :  { %811 = vset.pattern.permute.xlu0 %v933_v53  ;;  %v65_v59 = vmul.f32 %v882_v50, %v1120_v2 }
 0x19d   :  { %341 = vperm.xlu0 %811, %v1173_v8   ;;  %140 = vperm.xlu1 %808, %v118_v32  }
 0x1a1   :  { %345 = vperm.xlu0 %811, %v1164_v30   ;;  %145 = vperm.xlu1 %808, %v119_v45  }
 0x1a5   :  { %353 = vperm.xlu0 %811, %v1168_v35   ;;  %809 = vset.pattern.permute.xlu1 %v933_v53 }
 0x1a6   :  { %162 = vperm.xlu1 %809, %v116_v31  }
 0x1a9   :  { %814 = vset.pattern.permute.xlu0 %v934_v9 }
 0x1aa   :  { %504 = vperm.xlu0 %814, %v1168_v35   ;;  %166 = vperm.xlu1 %809, %v117_v47  }
 0x1ac   :  { %v256_v34 = vpop.xlane.xlu1 %255 }
 0x1ad   :  { %883 = vrcp.f32 %v256_v34  ;;  %v259_v48 = vpop.xlane.xlu0 %258 }
 0x1ae   :  { %170 = vperm.xlu1 %809, %v118_v32  }
 0x1b0   :  { %v265_v54 = vpop.xlane.xlu1 %264 }
 0x1b1   :  { %v262_v55 = vpop.xlane.xlu0 %261 }
 0x1b2   :  { %885 = vrcp.f32 %v262_v55  ;;  %174 = vperm.xlu1 %809, %v119_v45  }
 0x1b3   :  { %887 = vrcp.f32 %v265_v54  ;;  %v716_v54 = vunpack.c.l.bf16 %v715_v5  ;;  %v783_v5 = vld [vmem:[%s1321_s2 + $0x50] sm:$0xff]  }
 0x1b4   :  { %889 = vrcp.f32 %v259_v48  ;;  %v729_v48 = vunpack.c.h.bf16 %v780_v33 }
 0x1b5   :  { %v407_v37 = vpop.xlane.xlu1 %406 }
 0x1b6   :  { %810 = vset.pattern.permute.xlu1 %v932_v52 }
 0x1b7   :  { %187 = vperm.xlu1 %810, %v1173_v8  }
 0x1b9   :  { %v410_v58 = vpop.xlane.xlu0 %409 }
 0x1ba   :  { %v884_v60 = vpop.eup %883 }
 0x1bb   :  { %197 = vperm.xlu1 %810, %v65_v59   ;;  %v270_v63 = vmul.f32 %v884_v60, %v1059_v56 }
 0x1bd   :  { %v413_v3 = vpop.xlane.xlu0 %412  ;;  %285 = vperm.xlu0 %814, %v270_v63  }
 0x1be   :  { %891 = vrcp.f32 %v413_v3 }
 0x1bf   :  { %v886_v4 = vpop.eup %885  ;;  %812 = vset.pattern.permute.xlu1 %v933_v53 }
 0x1c0   :  { %349 = vperm.xlu1 %812, %v65_v59   ;;  %v272_v7 = vmul.f32 %v886_v4, %v1068_v62  ;;  %v888_v10 = vpop.eup %887 }
 0x1c1   :  { %v416_v52 = vpop.xlane.xlu0 %415  ;;  %v273_v11 = vmul.f32 %v888_v10, %v1066_v61  ;;  %v890_v2 = vpop.eup %889 }
 0x1c2   :  { %295 = vperm.xlu0 %814, %v272_v7   ;;  %v271_v16 = vmul.f32 %v890_v2, %v1061_v57  ;;  %v937_v57 = vmov 7  }
 0x1c4   :  { %813 = vset.pattern.permute.xlu1 %v934_v9 }
 0x1c5   :  { %v558_v15 = vpop.xlane.xlu0 %557  ;;  %492 = vperm.xlu1 %813, %v1173_v8  }
 0x1c6   :  { %893 = vrcp.f32 %v558_v15  ;;  %300 = vperm.xlu0 %814, %v273_v11  }
 0x1c9   :  { %v561_v56 = vpop.xlane.xlu0 %560  ;;  %496 = vperm.xlu1 %813, %v1164_v30  }
 0x1ca   :  { %818 = vset.pattern.permute.xlu0 %v935_v17 }
 0x1cb   :  { %v892_v62 = vpop.eup %891  ;;  %321 = vperm.xlu0 %818, %v271_v16  }
 0x1cc   :  { %v423_v61 = vmul.f32 %v892_v62, %v1081_v18 }
 0x1cd   :  { %v564_v19 = vpop.xlane.xlu0 %563  ;;  %500 = vperm.xlu1 %813, %v65_v59  }
 0x1cf   :  { %820 = vset.pattern.permute.xlu0 %v936_v20 }
 0x1d0   :  { %446 = vperm.xlu0 %820, %v423_v61  }
 0x1d1   :  { %v567_v21 = vpop.xlane.xlu0 %566  ;;  %815 = vset.pattern.permute.xlu1 %v935_v17 }
 0x1d2   :  { %895 = vrcp.f32 %v567_v21  ;;  %643 = vperm.xlu1 %815, %v1173_v8   ;;  %v728_v8 = vunpack.c.l.bf16 %v780_v33 }
 0x1d3   :  { %v894_v23 = vpop.eup %893  ;;  %897 = vrcp.f32 %v407_v37 }
 0x1d4   :  { %823 = vset.pattern.permute.xlu0 %v937_v57  ;;  %v572_v36 = vmul.f32 %v894_v23, %v1088_v24  ;;  %899 = vrcp.f32 %v410_v58 }
 0x1d5   :  { %901 = vrcp.f32 %v416_v52 }
 0x1d6   :  { %619 = vperm.xlu0 %823, %v572_v36   ;;  %647 = vperm.xlu1 %815, %v1164_v30   ;;  %903 = vrcp.f32 %v561_v56 }
 0x1d7   :  { %905 = vrcp.f32 %v564_v19 }
 0x1da   :  { %816 = vset.pattern.permute.xlu1 %v934_v9 }
 0x1db   :  { %290 = vperm.xlu1 %816, %v271_v16  }
 0x1df   :  { %v896_v18 = vpop.eup %895  ;;  %817 = vset.pattern.permute.xlu1 %v935_v17 }
 0x1e0   :  { %317 = vperm.xlu1 %817, %v270_v63   ;;  %v575_v38 = vmul.f32 %v896_v18, %v1097_v27  ;;  %v898_v24 = vpop.eup %897  ;;  %v938_v27 = vmov 5   ;;  %v1243_v18 = vld [vmem:[%s1321_s2 + $0x18] sm:$0xff]  }
 0x1e1   :  { %v421_v39 = vmul.f32 %v898_v24, %v1073_v6  ;;  %v900_v40 = vpop.eup %899  ;;  %v939_v6 = vmov 6  }
 0x1e2   :  { %631 = vperm.xlu0 %823, %v575_v38   ;;  %v422_v41 = vmul.f32 %v900_v40, %v1077_v14  ;;  %v902_v42 = vpop.eup %901 }
 0x1e3   :  { %v424_v43 = vmul.f32 %v902_v42, %v1085_v22  ;;  %v904_v1 = vpop.eup %903 }
 0x1e4   :  { %325 = vperm.xlu1 %817, %v272_v7   ;;  %v573_v29 = vmul.f32 %v904_v1, %v1091_v25  ;;  %v906_v14 = vpop.eup %905  ;;  %v779_v25 = vld [vmem:[%s1321_s2 + $0x40] sm:$0xff]   ;;  %v73_v1 = vld [vmem:[%s1322_s3 + $0x10] sm:$0xff] }
 0x1e5   :  { %v574_v0 = vmul.f32 %v906_v14, %v1094_v26  ;;  %v725_v30 = vunpack.c.h.bf16 %v779_v25  ;;  %v778_v26 = vld [vmem:[%s1321_s2 + $0x8] sm:$0xff]   ;;  %v724_v51 = vunpack.c.l.bf16 %v779_v25 }
 0x1e6   :  { %825 = vset.pattern.permute.xlu0 %v935_v17  ;;  %v720_v47 = vunpack.c.l.bf16 %v778_v26  ;;  %v721_v9 = vunpack.c.h.bf16 %v778_v26 }
 0x1e7   :  { %651 = vperm.xlu0 %825, %v65_v59  }
 0x1e8   :  { %329 = vperm.xlu1 %817, %v273_v11  }
 0x1ec   :  { %819 = vset.pattern.permute.xlu1 %v936_v20 }
 0x1ed   :  { %436 = vperm.xlu1 %819, %v421_v39  }
 0x1f1   :  { %441 = vperm.xlu1 %819, %v422_v41  }
 0x1f5   :  { %451 = vperm.xlu1 %819, %v424_v43  }
 0x1f9   :  { %821 = vset.pattern.permute.xlu1 %v938_v27 }
 0x1fa   :  { %468 = vperm.xlu1 %821, %v421_v39   ;;  %v736_v39 = vunpack.c.l.bf16 %v1243_v18 }
 0x1fe   :  { %472 = vperm.xlu1 %821, %v422_v41  }
 0x202   :  { %476 = vperm.xlu1 %821, %v423_v61  }
 0x206   :  { %480 = vperm.xlu1 %821, %v424_v43  }
 0x20a   :  { %822 = vset.pattern.permute.xlu1 %v939_v6 }
 0x20b   :  { %587 = vperm.xlu1 %822, %v572_v36   ;;  %v131_v55 = vpop.permute.xlu0 %130 }
 0x20f   :  { %592 = vperm.xlu1 %822, %v573_v29   ;;  %v193_v52 = vpop.permute.xlu0 %192 }
 0x213   :  { %597 = vperm.xlu1 %822, %v574_v0   ;;  %v1224_v2 = vpop.permute.xlu0 %202 }
 0x214   :  { %v136_v22 = vpop.permute.xlu1 %135 }
 0x215   :  { %v149_v46 = vmul.f32 %v717_v13, %v136_v22 }
 0x217   :  { %602 = vperm.xlu1 %822, %v575_v38   ;;  %v1248_v38 = vld [vmem:[%s1321_s2 + $0x58] sm:$0xff]  }
 0x218   :  { %v141_v28 = vpop.permute.xlu1 %140  ;;  %v744_v40 = vunpack.c.l.bf16 %v1248_v38 }
 0x219   :  { %v150_v45 = vmul.f32 %v720_v47, %v141_v28  ;;  %v787_v47 = vld [vmem:[%s1321_s2 + $0x60] sm:$0xff]  }
 0x21b   :  { %824 = vset.pattern.permute.xlu1 %v937_v57 }
 0x21c   :  { %v146_v44 = vpop.permute.xlu1 %145  ;;  %623 = vperm.xlu1 %824, %v573_v29  }
 0x21d   :  { %v151_v60 = vmul.f32 %v721_v9, %v146_v44  ;;  %v781_v44 = vld [vmem:[%s1321_s2 + $0x10] sm:$0xff]  }
 0x21e   :  { %v732_v13 = vunpack.c.l.bf16 %v781_v44  ;;  %v733_v26 = vunpack.c.h.bf16 %v781_v44 }
 0x220   :  { %627 = vperm.xlu1 %824, %v574_v0  }
 0x221   :  { %v163_v31 = vpop.permute.xlu1 %162 }
 0x222   :  { %v177_v58 = vmul.f32 %v724_v51, %v163_v31  ;;  %v740_v31 = vunpack.c.l.bf16 %v783_v5 }
 0x224   :  { %826 = vset.pattern.permute.xlu1 %v935_v17  ;;  %v342_v17 = vpop.permute.xlu0 %341 }
 0x225   :  { %v167_v12 = vpop.permute.xlu1 %166  ;;  %655 = vperm.xlu1 %826, %v1168_v35   ;;  %v148_v35 = vmul.f32 %v716_v54, %v131_v55  ;;  %v71_v54 = vld [vmem:[%s1322_s3] sm:$0xff] }
 0x226   :  { %v178_v49 = vmul.f32 %v725_v30, %v167_v12  ;;  %v741_v12 = vunpack.c.h.bf16 %v783_v5 }
 0x227   :  { %v181_v4 = vadd.f32 %v177_v58, %v148_v35 }
 0x228   :  { %v1218_v32 = vadd.f32 %v178_v49, %v149_v46  ;;  %v346_v19 = vpop.permute.xlu0 %345  ;;  %v785_v46 = vld [vmem:[%s1321_s2 + $0x20] sm:$0xff]  }
 0x229   :  { %v171_v53 = vpop.permute.xlu1 %170  ;;  %v748_v9 = vunpack.c.l.bf16 %v785_v46 }
 0x22a   :  { %v179_v34 = vmul.f32 %v728_v8, %v171_v53 }
 0x22c   :  { %v183_v50 = vadd.f32 %v179_v34, %v150_v45  ;;  %v1232_v20 = vpop.permute.xlu0 %353  ;;  %v756_v34 = vunpack.c.l.bf16 %v787_v47 }
 0x22d   :  { %v175_v59 = vpop.permute.xlu1 %174 }
 0x22e   :  { %v180_v63 = vmul.f32 %v729_v48, %v175_v59  ;;  %v786_v59 = vld [vmem:[%s1321_s2 + $0x28] sm:$0xff]  }
 0x230   :  { %v1220_v3 = vadd.f32 %v180_v63, %v151_v60  ;;  %v1238_v57 = vpop.permute.xlu0 %504 }
 0x232   :  { %v188_v7 = vpop.permute.xlu1 %187 }
 0x233   :  { %v1222_v10 = vmul.f32 %v188_v7, %v181_v4  ;;  %v757_v4 = vunpack.c.h.bf16 %v787_v47  ;;  %v788_v7 = vld [vmem:[%s1321_s2 + $0x68] sm:$0xff]  }
 0x236   :  { %v198_v11 = vpop.permute.xlu1 %197 }
 0x237   :  { %v207_v15 = vmul.f32 %v198_v11, %v183_v50  ;;  %v749_v50 = vunpack.c.h.bf16 %v785_v46  ;;  %v206_v11 = vmul.f32 %v193_v52, %v1218_v32 }
 0x238   :  { %v286_v37 = vpop.permute.xlu0 %285 }
 0x239   :  { %v211_v14 = vadd.f32 %v207_v15, %v73_v1  ;;  %v303_v49 = vmul.f32 %v732_v13, %v286_v37  ;;  %v209_v15 = vadd.f32 %v1222_v10, %v71_v54  ;;  %v752_v37 = vunpack.c.l.bf16 %v786_v59 }
 0x23a   :  { %v761_v54 = vunpack.c.h.bf16 %v788_v7 }
 0x23b   :  { %v350_v56 = vpop.permute.xlu1 %349 }
 0x23d   :  { %v296_v41 = vpop.permute.xlu0 %295 }
 0x23e   :  { %v305_v43 = vmul.f32 %v736_v39, %v296_v41 }
 0x240   :  { %v1226_v16 = vpop.permute.xlu1 %492 }
 0x241   :  { %v1263_v25 = vpop.permute.xlu0 %300 }
 0x244   :  { %v1228_v62 = vpop.permute.xlu1 %496 }
 0x246   :  { %v322_v8 = vpop.permute.xlu0 %321 }
 0x247   :  { %v333_v48 = vmul.f32 %v741_v12, %v322_v8 }
 0x248   :  { %v1230_v61 = vpop.permute.xlu1 %500 }
 0x24d   :  { %v1234_v21 = vpop.permute.xlu1 %643 }
 0x251   :  { %v1236_v23 = vpop.permute.xlu1 %647 }
 0x256   :  { %v291_v36 = vpop.permute.xlu1 %290 }
 0x257   :  { %v304_v53 = vmul.f32 %v733_v26, %v291_v36  ;;  %v72_v36 = vld [vmem:[%s1322_s3 + $0x8] sm:$0xff] }
 0x258   :  { %v210_v1 = vadd.f32 %v206_v11, %v72_v36 }
 0x259   :  { %v337_v55 = vadd.f32 %v333_v48, %v304_v53  ;;  %v737_v48 = vunpack.c.h.bf16 %v1243_v18 }
 0x25b   :  { %v318_v24 = vpop.permute.xlu1 %317 }
 0x25c   :  { %v332_v33 = vmul.f32 %v740_v31, %v318_v24  ;;  %v357_v24 = vmul.f32 %v346_v19, %v337_v55  ;;  %v791_v19 = vld [vmem:[%s1321_s2 + $0x70] sm:$0xff]  }
 0x25e   :  { %v336_v45 = vadd.f32 %v332_v33, %v303_v49 }
 0x25f   :  { %v326_v42 = vpop.permute.xlu1 %325 }
 0x260   :  { %v334_v27 = vmul.f32 %v744_v40, %v326_v42  ;;  %v356_v60 = vmul.f32 %v342_v17, %v336_v45  ;;  %v760_v17 = vunpack.c.l.bf16 %v788_v7 }
 0x262   :  { %v338_v6 = vadd.f32 %v334_v27, %v305_v43  ;;  %v360_v40 = vadd.f32 %v356_v60, %v209_v15  ;;  %v447_v27 = vpop.permute.xlu0 %446  ;;  %v306_v60 = vmul.f32 %v737_v48, %v1263_v25  ;;  %v208_v25 = vmul.f32 %v1224_v2, %v1220_v3 }
 0x263   :  { %v1255_v29 = vpop.permute.xlu1 %329  ;;  %v456_v10 = vmul.f32 %v752_v37, %v447_v27 }
 0x264   :  { %v358_v0 = vmul.f32 %v350_v56, %v338_v6 }
 0x266   :  { %v362_v22 = vadd.f32 %v358_v0, %v211_v14  ;;  %v361_v14 = vadd.f32 %v357_v24, %v210_v1  ;;  %v620_v33 = vpop.permute.xlu0 %619  ;;  %v74_v24 = vld [vmem:[%s1322_s3 + $0x18] sm:$0xff] }
 0x267   :  { %v212_v27 = vadd.f32 %v208_v25, %v74_v24 }
 0x268   :  { %v437_v28 = vpop.permute.xlu1 %436 }
 0x269   :  { %v454_v63 = vmul.f32 %v748_v9, %v437_v28 }
 0x26a   :  { %v632_v36 = vpop.permute.xlu0 %631 }
 0x26c   :  { %v442_v30 = vpop.permute.xlu1 %441 }
 0x26d   :  { %v455_v41 = vmul.f32 %v749_v50, %v442_v30  ;;  %v772_v30 = vunpack.c.l.bf16 %v791_v19  ;;  %v753_v50 = vunpack.c.h.bf16 %v786_v59 }
 0x270   :  { %v1271_v51 = vpop.permute.xlu1 %451 }
 0x271   :  { %v457_v18 = vmul.f32 %v753_v50, %v1271_v51 }
 0x275   :  { %v469_v58 = vpop.permute.xlu1 %468 }
 0x276   :  { %v483_v35 = vmul.f32 %v756_v34, %v469_v58  ;;  %v745_v34 = vunpack.c.h.bf16 %v1248_v38  ;;  %v773_v58 = vunpack.c.h.bf16 %v791_v19  ;;  %v792_v38 = vld [vmem:[%s1321_s2 + $0x78] sm:$0xff]  }
 0x277   :  { %v776_v15 = vunpack.c.l.bf16 %v792_v38 }
 0x278   :  { %v487_v56 = vadd.f32 %v483_v35, %v454_v63  ;;  %v335_v55 = vmul.f32 %v745_v34, %v1255_v29 }
 0x279   :  { %v473_v39 = vpop.permute.xlu1 %472 }
 0x27a   :  { %v507_v42 = vmul.f32 %v1226_v16, %v487_v56  ;;  %v484_v43 = vmul.f32 %v757_v4, %v473_v39  ;;  %v789_v16 = vld [vmem:[%s1321_s2 + $0x30] sm:$0xff]   ;;  %v339_v35 = vadd.f32 %v335_v55, %v306_v60  ;;  %v777_v56 = vunpack.c.h.bf16 %v792_v38 }
 0x27b   :  { %v764_v26 = vunpack.c.l.bf16 %v789_v16 }
 0x27c   :  { %v511_v6 = vadd.f32 %v507_v42, %v360_v40  ;;  %v488_v32 = vadd.f32 %v484_v43, %v455_v41  ;;  %v637_v1 = vmul.f32 %v777_v56, %v632_v36 }
 0x27d   :  { %v477_v52 = vpop.permute.xlu1 %476 }
 0x27e   :  { %v508_v0 = vmul.f32 %v1228_v62, %v488_v32  ;;  %v485_v28 = vmul.f32 %v760_v17, %v477_v52  ;;  %v634_v62 = vmul.f32 %v772_v30, %v620_v33  ;;  %v359_v17 = vmul.f32 %v1232_v20, %v339_v35  ;;  %v652_v32 = vpop.permute.xlu0 %651 }
 0x280   :  { %v512_v44 = vadd.f32 %v508_v0, %v361_v14  ;;  %v489_v5 = vadd.f32 %v485_v28, %v456_v10  ;;  %v363_v52 = vadd.f32 %v359_v17, %v212_v27 }
 0x281   :  { %v481_v31 = vpop.permute.xlu1 %480 }
 0x282   :  { %v509_v13 = vmul.f32 %v1230_v61, %v489_v5  ;;  %v486_v63 = vmul.f32 %v761_v54, %v481_v31 }
 0x284   :  { %v513_v12 = vadd.f32 %v509_v13, %v362_v22  ;;  %v765_v22 = vunpack.c.h.bf16 %v789_v16  ;;  %v490_v37 = vadd.f32 %v486_v63, %v457_v18 }
 0x286   :  { %v588_v46 = vpop.permute.xlu1 %587  ;;  %v510_v3 = vmul.f32 %v1238_v57, %v490_v37 }
 0x287   :  { %v605_v47 = vmul.f32 %v764_v26, %v588_v46 }
 0x288   :  { %v514_v20 = vadd.f32 %v510_v3, %v363_v52 }
 0x289   :  { %v638_v49 = vadd.f32 %v634_v62, %v605_v47 }
 0x28a   :  { %v593_v8 = vpop.permute.xlu1 %592 }
 0x28b   :  { %v658_v53 = vmul.f32 %v1234_v21, %v638_v49  ;;  %v790_v21 = vld [vmem:[%s1321_s2 + $0x38] sm:$0xff]   ;;  %v606_v29 = vmul.f32 %v765_v22, %v593_v8  ;;  %s940_s2 = smov [#allocation2]  }
 0x28c   :  { %v769_v4 = vunpack.c.h.bf16 %v790_v21  ;;  %v768_v59 = vunpack.c.l.bf16 %v790_v21  ;;  %s675_s3 = sshll.u32 %s940_s2, 4  ;;  %s676_s3 = int_to_ptr.vmem [resolvable:$true] %s675_s3 }
 0x28d   :  { %v662_v45 = vadd.f32 %v658_v53, %v511_v6  ;;  %s907_s18 = scalar_lea.vmem %s676_s3, 512  ;;  %p912_p1 = scmp.lt.s32.totalorder %s676_s3, %s676_s3 }
 0x28e   :  { %v598_v9 = vpop.permute.xlu1 %597  ;;  %p908_p0 = scmp.ne.s32.totalorder %s676_s3, %s907_s18  ;;  %p913_p2 = scmp.lt.s32.totalorder %s907_s18, %s907_s18 }
 0x28f   :  { %666 = vst [vmem:[#allocation2] sm:$0xff] %v662_v45  ;;  %v607_v41 = vmul.f32 %v768_v59, %v598_v9 }
 0x290   :  { %p914_p3 = por %p913_p2, %p912_p1 }
 0x292   :  { %v603_v61 = vpop.permute.xlu1 %602  ;;  %p915_p4 = pnand %p914_p3, %p908_p0 }
 0x293   :  { %v608_v51 = vmul.f32 %v769_v4, %v603_v61 }
 0x295   :  { %v641_v10 = vadd.f32 %v637_v1, %v608_v51 }
 0x297   :  { %v624_v7 = vpop.permute.xlu1 %623 }
 0x298   :  { %v635_v11 = vmul.f32 %v773_v58, %v624_v7 }
 0x29a   :  { %v639_v39 = vadd.f32 %v635_v11, %v606_v29 }
 0x29b   :  { %v628_v40 = vpop.permute.xlu1 %627 }
 0x29c   :  { %v659_v42 = vmul.f32 %v1236_v23, %v639_v39  ;;  %v636_v43 = vmul.f32 %v776_v15, %v628_v40 }
 0x29e   :  { %v663_v2 = vadd.f32 %v659_v42, %v512_v44  ;;  %v640_v6 = vadd.f32 %v636_v43, %v607_v41 }
 0x2a0   :  { %667 = vst [vmem:[#allocation2 + $0x8] sm:$0xff] %v663_v2  ;;  %v660_v14 = vmul.f32 %v652_v32, %v640_v6  ;;  %v656_v0 = vpop.permute.xlu1 %655 }
 0x2a1   :  { %v661_v28 = vmul.f32 %v656_v0, %v641_v10 }
 0x2a2   :  { %v664_v19 = vadd.f32 %v660_v14, %v513_v12 }
 0x2a3   :  { %v665_v5 = vadd.f32 %v661_v28, %v514_v20 }
 0x2a4   :  { %668 = vst [vmem:[#allocation2 + $0x10] sm:$0xff] %v664_v19 }
 0x2a5   :  { %669 = vst [vmem:[#allocation2 + $0x18] sm:$0xff] %v665_v5 }
 0x2a6   :  { %918 = shalt.err (!%p915_p4)
}
 0x2a7   :  { %s941_s19 = smov 128   ;;  %s942_s20 = smov 8  }
 0x2a8   :  { %681 = dma.vmem_to_hbm [thread:$0]  %s676_s3, 512, %s1323_s4, [#allocation3], %s941_s19, %s941_s19, %s942_s20  }
 0x2a9   :  { %927 = dma.done.wait [#allocation3], 512  }
 0x2aa   :  { %928 = vsyncadd [#allocation3], 4294966784 }
 0x2ab   :  { %685 = vsyncpa [#allocation3], 1 }

</bundles_post_ra>
